<compile_context>
chip_gen: v7x
topology: tpu7x:2x2x1
jax: 0.10.0
libtpu: 0.0.40
codegen_flags: <defaults>
</compile_context>

<pallas_src>
import functools

import jax
import jax.numpy as jnp
from jax.experimental import pallas as pl
from jax.experimental.pallas import tpu as pltpu

LANE = 128


# ----------------------------- Pallas kernels ------------------------------

def _matmul_bias_act_kernel(x_ref, w_ref, b_ref, o_ref, *, apply_sigmoid):
    """One M-tile of sigmoid?(x @ w + b).  x:(tm,K) bf16, w:(K,Np) bf16."""
    acc = jnp.dot(x_ref[...], w_ref[...], preferred_element_type=jnp.float32)
    acc = acc + b_ref[...]
    if apply_sigmoid:
        acc = jax.nn.sigmoid(acc)
    o_ref[...] = acc.astype(o_ref.dtype)


def pallas_linear(x, w, b, *, sigmoid: bool, tile_m: int = 256):
    """x:(M,K) -> (M,Np).  w:(K,Np) bf16, b:(1,Np) f32, Np a multiple of 128."""
    M, K = x.shape
    Kw, Np = w.shape
    assert K == Kw and Np % LANE == 0 and b.shape == (1, Np)
    tile_m = min(tile_m, ((M + 7) // 8) * 8)   # never a tile bigger than needed
    kernel = functools.partial(_matmul_bias_act_kernel, apply_sigmoid=sigmoid)
    return pl.pallas_call(
        kernel,
        out_shape=jax.ShapeDtypeStruct((M, Np), jnp.float32),
        grid=(pl.cdiv(M, tile_m),),
        in_specs=[
            pl.BlockSpec((tile_m, K), lambda i: (i, 0)),
            pl.BlockSpec((K, Np), lambda i: (0, 0)),
            pl.BlockSpec((1, Np), lambda i: (0, 0)),
        ],
        out_specs=pl.BlockSpec((tile_m, Np), lambda i: (i, 0)),
        compiler_params=pltpu.CompilerParams(
            dimension_semantics=("parallel",)),
    )(x.astype(jnp.bfloat16), w, b)


def _pool_kernel(x_ref, o_ref, *, C):
    """2x2 max-pool.  x_ref block: (1, 2, Wo, 2C) -- two H rows of one image,
    with the W-pair packed onto the lane dim.  All slices are lane-aligned."""
    r = jnp.maximum(x_ref[0, 0], x_ref[0, 1])        # max over the H window
    o_ref[0, 0] = jnp.maximum(r[:, :C], r[:, C:])    # max over the W window


def maxpool2x2_nhwc(x):
    """x: (B, H, W, C) with C a multiple of 128 -> (B, H//2, W//2, C)."""
    B, H, W, C = x.shape
    assert H % 2 == 0 and W % 2 == 0 and C % LANE == 0
    Ho, Wo = H // 2, W // 2
    xv = x.reshape(B, H, Wo, 2 * C)                  # free reshape, lane-dense
    return pl.pallas_call(
        functools.partial(_pool_kernel, C=C),
        out_shape=jax.ShapeDtypeStruct((B, Ho, Wo, C), x.dtype),
        grid=(B, Ho),
        in_specs=[pl.BlockSpec((1, 2, Wo, 2 * C), lambda b, i: (b, i, 0, 0))],
        out_specs=pl.BlockSpec((1, 1, Wo, C), lambda b, i: (b, i, 0, 0)),
        compiler_params=pltpu.CompilerParams(
            dimension_semantics=("parallel", "parallel")),
    )(xv)


def _fc_head_kernel(x_ref, w1_ref, b1_ref, w2_ref, b2_ref, w3_ref, b3_ref,
                    o_ref):
    """Fused fc1+sigmoid, fc2+sigmoid, fc3 (all weights 128-lane padded)."""
    h = jnp.dot(x_ref[...], w1_ref[...], preferred_element_type=jnp.float32)
    h = jax.nn.sigmoid(h + b1_ref[...])
    h = jnp.dot(h.astype(w2_ref.dtype), w2_ref[...],
                preferred_element_type=jnp.float32)
    h = jax.nn.sigmoid(h + b2_ref[...])
    h = jnp.dot(h.astype(w3_ref.dtype), w3_ref[...],
                preferred_element_type=jnp.float32)
    o_ref[...] = (h + b3_ref[...]).astype(o_ref.dtype)


def pallas_fc_head(x, w1, b1, w2, b2, w3, b3):
    B, K = x.shape
    Np = w1.shape[1]
    full = lambda r, c: pl.BlockSpec((r, c), lambda i: (0, 0))
    return pl.pallas_call(
        _fc_head_kernel,
        out_shape=jax.ShapeDtypeStruct((B, Np), jnp.float32),
        grid=(1,),
        in_specs=[full(B, K),
                  full(K, Np), full(1, Np),
                  full(Np, Np), full(1, Np),
                  full(Np, Np), full(1, Np)],
        out_specs=full(B, Np),
    )(x.astype(jnp.bfloat16), w1, b1, w2, b2, w3, b3)


# ------------------------------- glue (JAX) --------------------------------

def im2col_nhwc(x, k, pad):
    """x: (B, H, W, C) -> (B*Ho*Wo, k*k*C); patch feature order = (kh, kw, cin).
    Cast to bf16 so the cols buffer (dominant HBM traffic) is half-width."""
    B, H, W, C = x.shape
    x = x.astype(jnp.bfloat16)
    if pad > 0:
        x = jnp.pad(x, ((0, 0), (pad, pad), (pad, pad), (0, 0)))
    Hp, Wp = H + 2 * pad, W + 2 * pad
    Ho, Wo = Hp - k + 1, Wp - k + 1
    patches = [x[:, ki:ki + Ho, kj:kj + Wo, :]
               for ki in range(k) for kj in range(k)]
    cols = jnp.concatenate(patches, axis=-1)          # (B, Ho, Wo, k*k*C)
    return cols.reshape(B * Ho * Wo, k * k * C), Ho, Wo


def _pad2d(a, rows, cols):
    out = jnp.zeros((rows, cols), a.dtype)
    return out.at[:a.shape[0], :a.shape[1]].set(a)


def init_params(key):
    """PyTorch-style U(-1/sqrt(fan_in), +1/sqrt(fan_in)) init, then packed for
    TPU: weights zero-padded to 128 output lanes (and 128 input lanes for the
    small FC layers) and cast to bf16; biases kept f32, shape (1, 128).
    Zero padding keeps the extra lanes mathematically inert."""
    def uniform(k, shape, fan_in):
        s = 1.0 / jnp.sqrt(float(fan_in))
        return jax.random.uniform(k, shape, jnp.float32, -s, s)

    keys = jax.random.split(key, 5)
    layers = {
        # name: (fan_in == logical K, logical n_out, padded K)
        "conv1": (1 * 5 * 5, 6, 25),     # Conv2d(1, 6, 5)
        "conv2": (6 * 5 * 5, 16, 150),   # Conv2d(6, 16, 5)
        "fc1":   (16 * 5 * 5, 120, 400), # Linear(400, 120)
        "fc2":   (120, 84, LANE),        # Linear(120, 84), K padded 120->128
        "fc3":   (84, 10, LANE),         # Linear(84, 10),  K padded 84->128
    }
    p = {}
    for i, (name, (fan_in, n_out, k_pad)) in enumerate(layers.items()):
        kw, kb = jax.random.split(keys[i])
        w = uniform(kw, (fan_in, n_out), fan_in)
        b = uniform(kb, (1, n_out), fan_in)
        p[name + "_w"] = _pad2d(w, k_pad, LANE).astype(jnp.bfloat16)
        p[name + "_b"] = _pad2d(b, 1, LANE)          # f32
    return p


def lenet_forward(params, img):
    """img: (B, 1, 28, 28) float32 (NCHW, as PyTorch) -> logits (B, 10)."""
    B = img.shape[0]
    x = jnp.transpose(img, (0, 2, 3, 1))                  # NHWC (B, 28, 28, 1)

    # conv1 (pad=2) + sigmoid, fused in the Pallas matmul kernel
    cols, Ho, Wo = im2col_nhwc(x, k=5, pad=2)             # (B*28*28, 25)
    h = pallas_linear(cols, params["conv1_w"], params["conv1_b"], sigmoid=True)
    h = h.reshape(B, Ho, Wo, LANE)                        # (B, 28, 28, 128)
    h = maxpool2x2_nhwc(h)                                # (B, 14, 14, 128)
    h = h[..., :6]                                        # drop padded channels

    # conv2 (pad=0) + sigmoid
    cols, Ho, Wo = im2col_nhwc(h, k=5, pad=0)             # (B*10*10, 150)
    h = pallas_linear(cols, params["conv2_w"], params["conv2_b"], sigmoid=True)
    h = h.reshape(B, Ho, Wo, LANE)                        # (B, 10, 10, 128)
    h = maxpool2x2_nhwc(h)                                # (B, 5, 5, 128)
    h = h[..., :16]                                       # (B, 5, 5, 16)

    # Flatten.  (h, w, c) feature order differs from PyTorch's (c, h, w) view,
    # but with randomly-initialized fc1 weights it is a permutation absorbed
    # into the weight layout (semantics-equivalent forward pass).
    flat = h.reshape(B, 16 * 5 * 5)                       # (B, 400)

    out = pallas_fc_head(flat,
                         params["fc1_w"], params["fc1_b"],
                         params["fc2_w"], params["fc2_b"],
                         params["fc3_w"], params["fc3_b"])  # (B, 128)
    return out[:, :10]                                    # logits (B, 10)


if __name__ == "__main__":
    key = jax.random.PRNGKey(0)
    k_params, k_input = jax.random.split(key)
    params = init_params(k_params)
    # LeNet's fc head requires 28x28 spatial input (16*5*5 = 400 features).
    x = jax.random.normal(k_input, (2, 1, 28, 28), dtype=jnp.float32)

    logits = jax.jit(lenet_forward)(params, x)
    jax.block_until_ready(logits)
    assert logits.shape == (2, 10) and logits.dtype == jnp.float32
    print("KERNEL_OK")
</pallas_src>

<mosaic_0001>
module attributes {stable_mosaic.version = 11 : i64} {
  func.func @_matmul_bias_act_kernel(%arg0: i32, %arg1: memref<256x25xbf16, #tpu.memory_space<vmem>>, %arg2: memref<25x128xbf16, #tpu.memory_space<vmem>>, %arg3: memref<1x128xf32, #tpu.memory_space<vmem>>, %arg4: memref<256x128xf32, #tpu.memory_space<vmem>>) attributes {dimension_semantics = [#tpu.dimension_semantics<parallel>], iteration_bounds = array<i64: 7>, scalar_prefetch = 0 : i64, scratch_operands = 0 : i64, tpu.core_type = #tpu.core_type<tc>, window_params = [{transform_indices = @transform_0, window_bounds = array<i64: 256, 25>}, {pipeline_mode = #tpu.pipeline_mode<synchronous>, transform_indices = @transform_1, window_bounds = array<i64: 25, 128>}, {pipeline_mode = #tpu.pipeline_mode<synchronous>, transform_indices = @transform_2, window_bounds = array<i64: 1, 128>}, {transform_indices = @transform_3, window_bounds = array<i64: 256, 128>}]} {
    %c0 = arith.constant 0 : index
    %c0_0 = arith.constant 0 : index
    %0 = vector.load %arg1[%c0, %c0_0] : memref<256x25xbf16, #tpu.memory_space<vmem>>, vector<256x25xbf16>
    %c0_1 = arith.constant 0 : index
    %c0_2 = arith.constant 0 : index
    %1 = vector.load %arg2[%c0_1, %c0_2] : memref<25x128xbf16, #tpu.memory_space<vmem>>, vector<25x128xbf16>
    %cst = arith.constant dense<0.000000e+00> : vector<256x128xf32>
    %2 = tpu.matmul %0, %1, %cst {dimension_numbers = #tpu.dot_dimension_numbers<[1], [0], [0], [1], [0, 0, 1, 1], [], []>} : vector<256x25xbf16>, vector<25x128xbf16>, vector<256x128xf32> -> vector<256x128xf32>
    %c0_3 = arith.constant 0 : index
    %c0_4 = arith.constant 0 : index
    %3 = vector.load %arg3[%c0_3, %c0_4] : memref<1x128xf32, #tpu.memory_space<vmem>>, vector<1x128xf32>
    %4 = vector.broadcast %3 : vector<1x128xf32> to vector<256x128xf32>
    %5 = arith.addf %2, %4 : vector<256x128xf32>
    %6 = arith.negf %5 : vector<256x128xf32>
    %7 = math.exp %6 : vector<256x128xf32>
    %cst_5 = arith.constant 1.000000e+00 : f32
    %8 = vector.broadcast %cst_5 : f32 to vector<256x128xf32>
    %9 = arith.addf %8, %7 : vector<256x128xf32>
    %10 = arith.divf %8, %9 : vector<256x128xf32>
    %c0_6 = arith.constant 0 : index
    %c0_7 = arith.constant 0 : index
    %11 = vector.load %arg4[%c0_6, %c0_7] : memref<256x128xf32, #tpu.memory_space<vmem>>, vector<256x128xf32>
    tpu.vector_store %arg4[%c0_6, %c0_7], %10 {strides = array<i32>} : memref<256x128xf32, #tpu.memory_space<vmem>>, vector<256x128xf32>,
    return
  }
  func.func @transform_0(%arg0: i32) -> (i32, i32) {
    %c0_i32 = arith.constant 0 : i32
    %c0_i32_0 = arith.constant 0 : i32
    return %arg0, %c0_i32 : i32, i32
  }
  func.func @transform_1(%arg0: i32) -> (i32, i32) {
    %c0_i32 = arith.constant 0 : i32
    %c0_i32_0 = arith.constant 0 : i32
    %c0_i32_1 = arith.constant 0 : i32
    return %c0_i32, %c0_i32_0 : i32, i32
  }
  func.func @transform_2(%arg0: i32) -> (i32, i32) {
    %c0_i32 = arith.constant 0 : i32
    %c0_i32_0 = arith.constant 0 : i32
    %c0_i32_1 = arith.constant 0 : i32
    return %c0_i32, %c0_i32_0 : i32, i32
  }
  func.func @transform_3(%arg0: i32) -> (i32, i32) {
    %c0_i32 = arith.constant 0 : i32
    %c0_i32_0 = arith.constant 0 : i32
    return %arg0, %c0_i32 : i32, i32
  }
}

module attributes {stable_mosaic.version = 11 : i64} {
  func.func @_pool_kernel(%arg0: i32, %arg1: i32, %arg2: memref<1x2x14x256xf32, #tpu.memory_space<vmem>>, %arg3: memref<1x1x14x128xf32, #tpu.memory_space<vmem>>) attributes {dimension_semantics = [#tpu.dimension_semantics<parallel>, #tpu.dimension_semantics<parallel>], iteration_bounds = array<i64: 2, 14>, scalar_prefetch = 0 : i64, scratch_operands = 0 : i64, tpu.core_type = #tpu.core_type<tc>, window_params = [{transform_indices = @transform_0, window_bounds = array<i64: 1, 2, 14, 256>}, {transform_indices = @transform_1, window_bounds = array<i64: 1, 1, 14, 128>}]} {
    %c0 = arith.constant 0 : index
    %c0_0 = arith.constant 0 : index
    %c0_1 = arith.constant 0 : index
    %c0_2 = arith.constant 0 : index
    %0 = vector.load %arg2[%c0, %c0_0, %c0_1, %c0_2] : memref<1x2x14x256xf32, #tpu.memory_space<vmem>>, vector<1x1x14x256xf32>
    %1 = vector.shape_cast %0 : vector<1x1x14x256xf32> to vector<14x256xf32>
    %c0_3 = arith.constant 0 : index
    %c1 = arith.constant 1 : index
    %c0_4 = arith.constant 0 : index
    %c0_5 = arith.constant 0 : index
    %2 = vector.load %arg2[%c0_3, %c1, %c0_4, %c0_5] : memref<1x2x14x256xf32, #tpu.memory_space<vmem>>, vector<1x1x14x256xf32>
    %3 = vector.shape_cast %2 : vector<1x1x14x256xf32> to vector<14x256xf32>
    %4 = arith.maximumf %1, %3 : vector<14x256xf32>
    %5 = vector.extract_strided_slice %4 {offsets = [0, 0], sizes = [14, 128], strides = [1, 1]} : vector<14x256xf32> to vector<14x128xf32>
    %6 = vector.extract_strided_slice %4 {offsets = [0, 128], sizes = [14, 128], strides = [1, 1]} : vector<14x256xf32> to vector<14x128xf32>
    %7 = arith.maximumf %5, %6 : vector<14x128xf32>
    %c0_6 = arith.constant 0 : index
    %c0_7 = arith.constant 0 : index
    %c0_8 = arith.constant 0 : index
    %c0_9 = arith.constant 0 : index
    %8 = vector.load %arg3[%c0_6, %c0_7, %c0_8, %c0_9] : memref<1x1x14x128xf32, #tpu.memory_space<vmem>>, vector<1x1x14x128xf32>
    %9 = vector.shape_cast %8 : vector<1x1x14x128xf32> to vector<14x128xf32>
    %10 = vector.shape_cast %7 : vector<14x128xf32> to vector<1x1x14x128xf32>
    tpu.vector_store %arg3[%c0_6, %c0_7, %c0_8, %c0_9], %10 {strides = array<i32>} : memref<1x1x14x128xf32, #tpu.memory_space<vmem>>, vector<1x1x14x128xf32>,
    return
  }
  func.func @transform_0(%arg0: i32, %arg1: i32) -> (i32, i32, i32, i32) {
    %c0_i32 = arith.constant 0 : i32
    %c0_i32_0 = arith.constant 0 : i32
    %c0_i32_1 = arith.constant 0 : i32
    return %arg0, %arg1, %c0_i32, %c0_i32_0 : i32, i32, i32, i32
  }
  func.func @transform_1(%arg0: i32, %arg1: i32) -> (i32, i32, i32, i32) {
    %c0_i32 = arith.constant 0 : i32
    %c0_i32_0 = arith.constant 0 : i32
    %c0_i32_1 = arith.constant 0 : i32
    return %arg0, %arg1, %c0_i32, %c0_i32_0 : i32, i32, i32, i32
  }
}

module attributes {stable_mosaic.version = 11 : i64} {
  func.func @_matmul_bias_act_kernel(%arg0: i32, %arg1: memref<200x150xbf16, #tpu.memory_space<vmem>>, %arg2: memref<150x128xbf16, #tpu.memory_space<vmem>>, %arg3: memref<1x128xf32, #tpu.memory_space<vmem>>, %arg4: memref<200x128xf32, #tpu.memory_space<vmem>>) attributes {dimension_semantics = [#tpu.dimension_semantics<parallel>], iteration_bounds = array<i64: 1>, scalar_prefetch = 0 : i64, scratch_operands = 0 : i64, tpu.core_type = #tpu.core_type<tc>, window_params = [{transform_indices = @transform_0, window_bounds = array<i64: 200, 150>}, {pipeline_mode = #tpu.pipeline_mode<synchronous>, transform_indices = @transform_1, window_bounds = array<i64: 150, 128>}, {pipeline_mode = #tpu.pipeline_mode<synchronous>, transform_indices = @transform_2, window_bounds = array<i64: 1, 128>}, {transform_indices = @transform_3, window_bounds = array<i64: 200, 128>}]} {
    %c0 = arith.constant 0 : index
    %c0_0 = arith.constant 0 : index
    %0 = vector.load %arg1[%c0, %c0_0] : memref<200x150xbf16, #tpu.memory_space<vmem>>, vector<200x150xbf16>
    %c0_1 = arith.constant 0 : index
    %c0_2 = arith.constant 0 : index
    %1 = vector.load %arg2[%c0_1, %c0_2] : memref<150x128xbf16, #tpu.memory_space<vmem>>, vector<150x128xbf16>
    %cst = arith.constant dense<0.000000e+00> : vector<200x128xf32>
    %2 = tpu.matmul %0, %1, %cst {dimension_numbers = #tpu.dot_dimension_numbers<[1], [0], [0], [1], [0, 0, 1, 1], [], []>} : vector<200x150xbf16>, vector<150x128xbf16>, vector<200x128xf32> -> vector<200x128xf32>
    %c0_3 = arith.constant 0 : index
    %c0_4 = arith.constant 0 : index
    %3 = vector.load %arg3[%c0_3, %c0_4] : memref<1x128xf32, #tpu.memory_space<vmem>>, vector<1x128xf32>
    %4 = vector.broadcast %3 : vector<1x128xf32> to vector<200x128xf32>
    %5 = arith.addf %2, %4 : vector<200x128xf32>
    %6 = arith.negf %5 : vector<200x128xf32>
    %7 = math.exp %6 : vector<200x128xf32>
    %cst_5 = arith.constant 1.000000e+00 : f32
    %8 = vector.broadcast %cst_5 : f32 to vector<200x128xf32>
    %9 = arith.addf %8, %7 : vector<200x128xf32>
    %10 = arith.divf %8, %9 : vector<200x128xf32>
    %c0_6 = arith.constant 0 : index
    %c0_7 = arith.constant 0 : index
    %11 = vector.load %arg4[%c0_6, %c0_7] : memref<200x128xf32, #tpu.memory_space<vmem>>, vector<200x128xf32>
    tpu.vector_store %arg4[%c0_6, %c0_7], %10 {strides = array<i32>} : memref<200x128xf32, #tpu.memory_space<vmem>>, vector<200x128xf32>,
    return
  }
  func.func @transform_0(%arg0: i32) -> (i32, i32) {
    %c0_i32 = arith.constant 0 : i32
    %c0_i32_0 = arith.constant 0 : i32
    return %arg0, %c0_i32 : i32, i32
  }
  func.func @transform_1(%arg0: i32) -> (i32, i32) {
    %c0_i32 = arith.constant 0 : i32
    %c0_i32_0 = arith.constant 0 : i32
    %c0_i32_1 = arith.constant 0 : i32
    return %c0_i32, %c0_i32_0 : i32, i32
  }
  func.func @transform_2(%arg0: i32) -> (i32, i32) {
    %c0_i32 = arith.constant 0 : i32
    %c0_i32_0 = arith.constant 0 : i32
    %c0_i32_1 = arith.constant 0 : i32
    return %c0_i32, %c0_i32_0 : i32, i32
  }
  func.func @transform_3(%arg0: i32) -> (i32, i32) {
    %c0_i32 = arith.constant 0 : i32
    %c0_i32_0 = arith.constant 0 : i32
    return %arg0, %c0_i32 : i32, i32
  }
}

module attributes {stable_mosaic.version = 11 : i64} {
  func.func @_pool_kernel(%arg0: i32, %arg1: i32, %arg2: memref<1x2x5x256xf32, #tpu.memory_space<vmem>>, %arg3: memref<1x1x5x128xf32, #tpu.memory_space<vmem>>) attributes {dimension_semantics = [#tpu.dimension_semantics<parallel>, #tpu.dimension_semantics<parallel>], iteration_bounds = array<i64: 2, 5>, scalar_prefetch = 0 : i64, scratch_operands = 0 : i64, tpu.core_type = #tpu.core_type<tc>, window_params = [{transform_indices = @transform_0, window_bounds = array<i64: 1, 2, 5, 256>}, {transform_indices = @transform_1, window_bounds = array<i64: 1, 1, 5, 128>}]} {
    %c0 = arith.constant 0 : index
    %c0_0 = arith.constant 0 : index
    %c0_1 = arith.constant 0 : index
    %c0_2 = arith.constant 0 : index
    %0 = vector.load %arg2[%c0, %c0_0, %c0_1, %c0_2] : memref<1x2x5x256xf32, #tpu.memory_space<vmem>>, vector<1x1x5x256xf32>
    %1 = vector.shape_cast %0 : vector<1x1x5x256xf32> to vector<5x256xf32>
    %c0_3 = arith.constant 0 : index
    %c1 = arith.constant 1 : index
    %c0_4 = arith.constant 0 : index
    %c0_5 = arith.constant 0 : index
    %2 = vector.load %arg2[%c0_3, %c1, %c0_4, %c0_5] : memref<1x2x5x256xf32, #tpu.memory_space<vmem>>, vector<1x1x5x256xf32>
    %3 = vector.shape_cast %2 : vector<1x1x5x256xf32> to vector<5x256xf32>
    %4 = arith.maximumf %1, %3 : vector<5x256xf32>
    %5 = vector.extract_strided_slice %4 {offsets = [0, 0], sizes = [5, 128], strides = [1, 1]} : vector<5x256xf32> to vector<5x128xf32>
    %6 = vector.extract_strided_slice %4 {offsets = [0, 128], sizes = [5, 128], strides = [1, 1]} : vector<5x256xf32> to vector<5x128xf32>
    %7 = arith.maximumf %5, %6 : vector<5x128xf32>
    %c0_6 = arith.constant 0 : index
    %c0_7 = arith.constant 0 : index
    %c0_8 = arith.constant 0 : index
    %c0_9 = arith.constant 0 : index
    %8 = vector.load %arg3[%c0_6, %c0_7, %c0_8, %c0_9] : memref<1x1x5x128xf32, #tpu.memory_space<vmem>>, vector<1x1x5x128xf32>
    %9 = vector.shape_cast %8 : vector<1x1x5x128xf32> to vector<5x128xf32>
    %10 = vector.shape_cast %7 : vector<5x128xf32> to vector<1x1x5x128xf32>
    tpu.vector_store %arg3[%c0_6, %c0_7, %c0_8, %c0_9], %10 {strides = array<i32>} : memref<1x1x5x128xf32, #tpu.memory_space<vmem>>, vector<1x1x5x128xf32>,
    return
  }
  func.func @transform_0(%arg0: i32, %arg1: i32) -> (i32, i32, i32, i32) {
    %c0_i32 = arith.constant 0 : i32
    %c0_i32_0 = arith.constant 0 : i32
    %c0_i32_1 = arith.constant 0 : i32
    return %arg0, %arg1, %c0_i32, %c0_i32_0 : i32, i32, i32, i32
  }
  func.func @transform_1(%arg0: i32, %arg1: i32) -> (i32, i32, i32, i32) {
    %c0_i32 = arith.constant 0 : i32
    %c0_i32_0 = arith.constant 0 : i32
    %c0_i32_1 = arith.constant 0 : i32
    return %arg0, %arg1, %c0_i32, %c0_i32_0 : i32, i32, i32, i32
  }
}

module attributes {stable_mosaic.version = 11 : i64} {
  func.func @_fc_head_kernel(%arg0: i32, %arg1: memref<2x400xbf16, #tpu.memory_space<vmem>>, %arg2: memref<400x128xbf16, #tpu.memory_space<vmem>>, %arg3: memref<1x128xf32, #tpu.memory_space<vmem>>, %arg4: memref<128x128xbf16, #tpu.memory_space<vmem>>, %arg5: memref<1x128xf32, #tpu.memory_space<vmem>>, %arg6: memref<128x128xbf16, #tpu.memory_space<vmem>>, %arg7: memref<1x128xf32, #tpu.memory_space<vmem>>, %arg8: memref<2x128xf32, #tpu.memory_space<vmem>>) attributes {dimension_semantics = [#tpu.dimension_semantics<arbitrary>], iteration_bounds = array<i64: 1>, scalar_prefetch = 0 : i64, scratch_operands = 0 : i64, tpu.core_type = #tpu.core_type<tc>, window_params = [{pipeline_mode = #tpu.pipeline_mode<synchronous>, transform_indices = @transform_0, window_bounds = array<i64: 2, 400>}, {pipeline_mode = #tpu.pipeline_mode<synchronous>, transform_indices = @transform_1, window_bounds = array<i64: 400, 128>}, {pipeline_mode = #tpu.pipeline_mode<synchronous>, transform_indices = @transform_2, window_bounds = array<i64: 1, 128>}, {pipeline_mode = #tpu.pipeline_mode<synchronous>, transform_indices = @transform_3, window_bounds = array<i64: 128, 128>}, {pipeline_mode = #tpu.pipeline_mode<synchronous>, transform_indices = @transform_4, window_bounds = array<i64: 1, 128>}, {pipeline_mode = #tpu.pipeline_mode<synchronous>, transform_indices = @transform_5, window_bounds = array<i64: 128, 128>}, {pipeline_mode = #tpu.pipeline_mode<synchronous>, transform_indices = @transform_6, window_bounds = array<i64: 1, 128>}, {pipeline_mode = #tpu.pipeline_mode<synchronous>, transform_indices = @transform_7, window_bounds = array<i64: 2, 128>}]} {
    %c0 = arith.constant 0 : index
    %c0_0 = arith.constant 0 : index
    %0 = vector.load %arg1[%c0, %c0_0] : memref<2x400xbf16, #tpu.memory_space<vmem>>, vector<2x400xbf16>
    %c0_1 = arith.constant 0 : index
    %c0_2 = arith.constant 0 : index
    %1 = vector.load %arg2[%c0_1, %c0_2] : memref<400x128xbf16, #tpu.memory_space<vmem>>, vector<400x128xbf16>
    %cst = arith.constant dense<0.000000e+00> : vector<2x128xf32>
    %2 = tpu.matmul %0, %1, %cst {dimension_numbers = #tpu.dot_dimension_numbers<[1], [0], [0], [1], [0, 0, 1, 1], [], []>} : vector<2x400xbf16>, vector<400x128xbf16>, vector<2x128xf32> -> vector<2x128xf32>
    %c0_3 = arith.constant 0 : index
    %c0_4 = arith.constant 0 : index
    %3 = vector.load %arg3[%c0_3, %c0_4] : memref<1x128xf32, #tpu.memory_space<vmem>>, vector<1x128xf32>
    %4 = vector.broadcast %3 : vector<1x128xf32> to vector<2x128xf32>
    %5 = arith.addf %2, %4 : vector<2x128xf32>
    %6 = arith.negf %5 : vector<2x128xf32>
    %7 = math.exp %6 : vector<2x128xf32>
    %cst_5 = arith.constant 1.000000e+00 : f32
    %8 = vector.broadcast %cst_5 : f32 to vector<2x128xf32>
    %9 = arith.addf %8, %7 : vector<2x128xf32>
    %10 = arith.divf %8, %9 : vector<2x128xf32>
    %11 = arith.truncf %10 : vector<2x128xf32> to vector<2x128xbf16>
    %c0_6 = arith.constant 0 : index
    %c0_7 = arith.constant 0 : index
    %12 = vector.load %arg4[%c0_6, %c0_7] : memref<128x128xbf16, #tpu.memory_space<vmem>>, vector<128x128xbf16>
    %cst_8 = arith.constant dense<0.000000e+00> : vector<2x128xf32>
    %13 = tpu.matmul %11, %12, %cst_8 {dimension_numbers = #tpu.dot_dimension_numbers<[1], [0], [0], [1], [0, 0, 1, 1], [], []>} : vector<2x128xbf16>, vector<128x128xbf16>, vector<2x128xf32> -> vector<2x128xf32>
    %c0_9 = arith.constant 0 : index
    %c0_10 = arith.constant 0 : index
    %14 = vector.load %arg5[%c0_9, %c0_10] : memref<1x128xf32, #tpu.memory_space<vmem>>, vector<1x128xf32>
    %15 = vector.broadcast %14 : vector<1x128xf32> to vector<2x128xf32>
    %16 = arith.addf %13, %15 : vector<2x128xf32>
    %17 = arith.negf %16 : vector<2x128xf32>
    %18 = math.exp %17 : vector<2x128xf32>
    %cst_11 = arith.constant 1.000000e+00 : f32
    %19 = vector.broadcast %cst_11 : f32 to vector<2x128xf32>
    %20 = arith.addf %19, %18 : vector<2x128xf32>
    %21 = arith.divf %19, %20 : vector<2x128xf32>
    %22 = arith.truncf %21 : vector<2x128xf32> to vector<2x128xbf16>
    %c0_12 = arith.constant 0 : index
    %c0_13 = arith.constant 0 : index
    %23 = vector.load %arg6[%c0_12, %c0_13] : memref<128x128xbf16, #tpu.memory_space<vmem>>, vector<128x128xbf16>
    %cst_14 = arith.constant dense<0.000000e+00> : vector<2x128xf32>
    %24 = tpu.matmul %22, %23, %cst_14 {dimension_numbers = #tpu.dot_dimension_numbers<[1], [0], [0], [1], [0, 0, 1, 1], [], []>} : vector<2x128xbf16>, vector<128x128xbf16>, vector<2x128xf32> -> vector<2x128xf32>
    %c0_15 = arith.constant 0 : index
    %c0_16 = arith.constant 0 : index
    %25 = vector.load %arg7[%c0_15, %c0_16] : memref<1x128xf32, #tpu.memory_space<vmem>>, vector<1x128xf32>
    %26 = vector.broadcast %25 : vector<1x128xf32> to vector<2x128xf32>
    %27 = arith.addf %24, %26 : vector<2x128xf32>
    %c0_17 = arith.constant 0 : index
    %c0_18 = arith.constant 0 : index
    %28 = vector.load %arg8[%c0_17, %c0_18] : memref<2x128xf32, #tpu.memory_space<vmem>>, vector<2x128xf32>
    tpu.vector_store %arg8[%c0_17, %c0_18], %27 {strides = array<i32>} : memref<2x128xf32, #tpu.memory_space<vmem>>, vector<2x128xf32>,
    return
  }
  func.func @transform_0(%arg0: i32) -> (i32, i32) {
    %c0_i32 = arith.constant 0 : i32
    %c0_i32_0 = arith.constant 0 : i32
    %c0_i32_1 = arith.constant 0 : i32
    return %c0_i32, %c0_i32_0 : i32, i32
  }
  func.func @transform_1(%arg0: i32) -> (i32, i32) {
    %c0_i32 = arith.constant 0 : i32
    %c0_i32_0 = arith.constant 0 : i32
    %c0_i32_1 = arith.constant 0 : i32
    return %c0_i32, %c0_i32_0 : i32, i32
  }
  func.func @transform_2(%arg0: i32) -> (i32, i32) {
    %c0_i32 = arith.constant 0 : i32
    %c0_i32_0 = arith.constant 0 : i32
    %c0_i32_1 = arith.constant 0 : i32
    return %c0_i32, %c0_i32_0 : i32, i32
  }
  func.func @transform_3(%arg0: i32) -> (i32, i32) {
    %c0_i32 = arith.constant 0 : i32
    %c0_i32_0 = arith.constant 0 : i32
    %c0_i32_1 = arith.constant 0 : i32
    return %c0_i32, %c0_i32_0 : i32, i32
  }
  func.func @transform_4(%arg0: i32) -> (i32, i32) {
    %c0_i32 = arith.constant 0 : i32
    %c0_i32_0 = arith.constant 0 : i32
    %c0_i32_1 = arith.constant 0 : i32
    return %c0_i32, %c0_i32_0 : i32, i32
  }
  func.func @transform_5(%arg0: i32) -> (i32, i32) {
    %c0_i32 = arith.constant 0 : i32
    %c0_i32_0 = arith.constant 0 : i32
    %c0_i32_1 = arith.constant 0 : i32
    return %c0_i32, %c0_i32_0 : i32, i32
  }
  func.func @transform_6(%arg0: i32) -> (i32, i32) {
    %c0_i32 = arith.constant 0 : i32
    %c0_i32_0 = arith.constant 0 : i32
    %c0_i32_1 = arith.constant 0 : i32
    return %c0_i32, %c0_i32_0 : i32, i32
  }
  func.func @transform_7(%arg0: i32) -> (i32, i32) {
    %c0_i32 = arith.constant 0 : i32
    %c0_i32_0 = arith.constant 0 : i32
    %c0_i32_1 = arith.constant 0 : i32
    return %c0_i32, %c0_i32_0 : i32, i32
  }
}

</mosaic_0001>

<bundles_post_ra>
// kernel: lenet_forward.6
= control target key start
LH: loop header
LB: loop body
LE: loop exit
PB: predicated region body
PF: predicated region fallthrough
CT: control target
= control target key end

     0   :  { %s378_s6 = smov 0   ;;  %s380_s7 = smov 0   ;;  %s429_s0 = inlined_call_operand.vmem [shape: f32[2,28,14,256], index: 0, kind: input, shape index: {}]   ;;  %s430_s1 = inlined_call_operand.vmem [shape: f32[2,14,14,128], index: 1, kind: output, shape index: {}]  }
   0x1   :  { %s382_s8 = smov 0   ;;  %s384_s9 = smov 0  }
   0x2   :  { %s386_s10 = smov 0  }
   0x3 LB: > { %s20_s11 = sadd.s32 1, %s358_s8  ;;  %s23_s12 = sadd.s32 1, %s362_s9  ;;  %s366_s10 = sphi %s386_s10, %s11_s10   ;;  %s362_s9 = sphi %s384_s9, %s434_s9   ;;  %s358_s8 = sphi %s382_s8, %s433_s8   ;;  %s354_s7 = sphi %s380_s7, %s432_s7   ;;  %s350_s6 = sphi %s378_s6, %s431_s6  }
   0x4   : > { %p21_p0 = scmp.ge.s32.totalorder %s20_s11, 14  ;;  %p274_p1 = scmp.ge.s32.totalorder %s366_s10, 1 }
   0x5   : > { %p109_p2 = scmp.lt.s32.totalorder %s366_s10, 29 }
   0x6   : > { %s436_s11 = smov (%p21_p0, %s20_s11), 0  ;;  %s438_s12 = smov (!%p21_p0, %s23_s12), %s362_s9 }
   0x7   : > { %p110_p3 = pnand %p274_p1, %p109_p2  ;;  %p25_p4 = scmp.ge.s32.totalorder %s438_s12, 2 }
   0x8   : > { %s275_s13 = sshll.u32 (!%p110_p3), %s350_s6, 1  ;;  %p139_p5 = scmp.lt.s32.totalorder (!%p110_p3), %s354_s7, 1 }
   0x9   : > { %s440_s12 = smov (%p25_p4, %s438_s12), 0  ;;  %113 = sbr.rel (%p110_p3) target bundleno = 30 (0x1e), region = 24 }
   0xa   : > { %p141_p6 = scmp.lt.s32.totalorder (!%p110_p3), %s275_s13, 27  ;;  %p151_p7 = scmp.lt.s32.totalorder (!%p110_p3), %s350_s6, 13 }
  0x10   : > { %s442_s7 = smov (!%p139_p5, %s354_s7), 1  ;;  %s444_s13 = smov (!%p141_p6, %s275_s13), 27 }
  0x11   : > { %s286_s14 = smul.u32 112, %s442_s7  ;;  %s276_s15 = sshll.u32 %s444_s13, 2 }
  0x12   : > { %s287_s21 = smul.u32 28, %s442_s7  ;;  %s446_s6 = smov (!%p151_p7, %s350_s6), 13 }
  0x13   : > { %s145_s16 = sadd.s32 %s286_s14, %s276_s15  ;;  %s278_s22 = sshll.u32 %s446_s6, 1 }
  0x14   : > { %s277_s17 = sshll.u32 %s145_s16, 3  ;;  %s155_s23 = sadd.s32 %s287_s21, %s278_s22 }
  0x15   : > { %s147_s20 = scalar_lea.vmem %s429_s0, %s277_s17  ;;  %s279_s24 = sshll.u32 %s155_s23, 3 }
  0x16   : > { %v158_v0 = vld [vmem:[%s147_s20] sm:$0xff]  ;;  %v159_v1 = vld [vmem:[%s147_s20 + $0x8] sm:$0xff]  ;;  %v160_v5 = vld [vmem:[%s147_s20 + $0x10] sm:$0x3f]  ;;  %s157_s27 = scalar_lea.vmem %s430_s1, %s279_s24 }
  0x17   : > { %v280_v2 = vld [vmem:[%s147_s20 + $0x20] sm:$0xff]  ;;  %v281_v3 = vld [vmem:[%s147_s20 + $0x28] sm:$0xff]  ;;  %v161_v6 = vld [vmem:[%s147_s20 + $0x18] sm:$0x3f] }
  0x18   : > { %v167_v4 = vmax.f32 %v158_v0, %v280_v2  ;;  %v168_v7 = vmax.f32 %v159_v1, %v281_v3  ;;  %v282_v8 = vld [vmem:[%s147_s20 + $0x30] sm:$0x3f]  ;;  %v283_v9 = vld [vmem:[%s147_s20 + $0x38] sm:$0x3f] }
  0x19   : > { %v169_v10 = vmax.f32 %v160_v5, %v282_v8  ;;  %v170_v11 = vmax.f32 %v161_v6, %v283_v9 }
  0x1a   : > { %v171_v12 = vmax.f32 %v167_v4, %v168_v7 }
  0x1b   : > { %v172_v13 = vmax.f32 %v169_v10, %v170_v11 }
  0x1c   : > { %173 = vst [vmem:[%s157_s27] sm:$0xff] %v171_v12 }
  0x1d   : > { %174 = vst [vmem:[%s157_s27 + $0x8] sm:$0x3f] %v172_v13 }
  0x1e PF: > { %s11_s10 = sadd.s32 1, %s366_s10   ;;  %s431_s6 = smov %s358_s8 }
  0x1f   : > { %p8_p8 = scmp.ge.s32.totalorder %s11_s10, 30   ;;  %s432_s7 = smov %s362_s9 }
  0x20   : > { %s433_s8 = smov %s436_s11  ;;  %s434_s9 = smov %s440_s12 }
  0x21   :  { %10 = sbr.rel (!%p8_p8) target bundleno = 3 (0x3), region = 55 }

// kernel: lenet_forward.5
= control target key start
LH: loop header
LB: loop body
LE: loop exit
PB: predicated region body
PF: predicated region fallthrough
CT: control target
= control target key end

     0   :  { %s1603_s12 = smov 0   ;;  %s1605_s13 = smov 0   ;;  %s1921_s0 = inlined_call_operand.vmem [shape: bf16[1568,25], index: 0, kind: input, shape index: {}]   ;;  %s1922_s1 = inlined_call_operand.vmem [shape: bf16[25,128], index: 1, kind: input, shape index: {}]   ;;  %s1923_s2 = inlined_call_operand.vmem [shape: f32[1,128], index: 2, kind: input, shape index: {}]   ;;  %s1924_s3 = inlined_call_operand.vmem [shape: f32[1568,128], index: 3, kind: output, shape index: {}]  }
   0x1   :  { %s1607_s14 = smov 0  }
   0x2 LB: > { %s1616_s15 = sadd.s32 4294967295, %s1548_s14   ;;  %s1618_s16 = sadd.s32 1, %s1548_s14   ;;  %s1548_s14 = sphi %s1607_s14, %s1933_s14   ;;  %s1544_s13 = sphi %s1605_s13, %s1932_s13   ;;  %s1540_s12 = sphi %s1603_s12, %s1931_s12  }
   0x3   : > { %s85_s17 = ssub.s32 %s1548_s14, %s1618_s16  ;;  %s88_s18 = sadd.s32 1, %s1544_s13 }
   0x4   : > { %p86_p0 = scmp.eq.s32.totalorder %s85_s17, 0  ;;  %p98_p1 = scmp.ne.s32.totalorder %s1544_s13, %s1540_s12 }
   0x5   : > { %p99_p2 = scmp.eq.s32.totalorder %s1616_s15, 6  ;;  %p1110_p3 = scmp.ge.s32.totalorder %s1548_s14, 1 }
   0x6   : > { %s1626_s19 = scalar_select %p86_p0, %s1544_s13, %s88_s18  }
   0x7   : > { %p1628_p4 = por %p99_p2, %p98_p1  ;;  %p146_p5 = scmp.lt.s32.totalorder %s1548_s14, 8 }
   0x9   : > { %p147_p6 = pnand %p1110_p3, %p146_p5 }
   0xa   : > { %v1348_v0 = vld [vmem:[%s1922_s1] sm:$0xff] (!%p147_p6)   ;;  %vm376_vm0 = vcmask (!%p147_p6), 1043456   ;;  %v1349_v1 = vld [vmem:[%s1922_s1 + $0x8] sm:$0x1f] (!%p147_p6)   ;;  %vm377_vm1 = vcmask (!%p147_p6), 1044480   ;;  %s1639_s25 = sshll.u32 (!%p147_p6), %s1616_s15, 5 }
   0xb   : > { %150 = sbr.rel (%p147_p6) target bundleno = 380 (0x17c), region = 32  ;;  %1219 = vmatprep.subr.bf16.mxu0 (!%p147_p6), %v1348_v0  ;;  %1255 = vmatprep.subr.bf16.mxu1 (!%p147_p6), %v1348_v0  ;;  %v1582_v2 = vmov (!%p147_p6), 65535   ;;  %p178_p7 = scmp.lt.s32.totalorder (!%p147_p6), %s1639_s25, 195  ;;  %vm327_vm2 = vcmask (!%p147_p6), 203776   ;;  %v1683_v22 = vld [vmem:[%s1923_s2] ss:$0 sm:$0xff] (!%p147_p6) }
   0xc   : > { %1220 = vmatpush3.bf16.msra.mxu0 (!%p147_p6), %v1348_v0  ;;  %1257 = vmatpush3.bf16.msra.mxu1 (!%p147_p6), %v1348_v0  ;;  %v378_v3 = vsel (!%p147_p6), %vm376_vm0, 4294967295, %v1582_v2  ;;  %s170_s6 = sand.u32 (!%p147_p6), 1, %s1540_s12  }
   0xd   : > { %v379_v4 = vsel (!%p147_p6), %vm377_vm1, %v378_v3, 0  ;;  %s1705_s7 = sshll.u32 (!%p147_p6), %s170_s6, 8 }
   0xe   : > { %v381_v5 = vand.u32 (!%p147_p6), %v1349_v1, %v379_v4  ;;  %s1726_s8 = scalar_lea.vmem (!%p147_p6), [#allocation2], %s1705_s7  }
  0x10   : > { %1221 = vmatprep.subr.bf16.mxu0 (!%p147_p6), %v381_v5  ;;  %1256 = vmatprep.subr.bf16.mxu1 (!%p147_p6), %v381_v5 }
  0x11   : > { %1222 = vmatpush3.bf16.msra.mxu0 (!%p147_p6), %v381_v5  ;;  %1258 = vmatpush3.bf16.msra.mxu1 (!%p147_p6), %v381_v5 }
  0x12   : > { %s179_s26 = scalar_select %p178_p7, %s1639_s25, 195 }
  0x13   : > { %s776_s9 = ssub.s32 (%p1628_p4), 196, %s1639_s25  ;;  %s1198_s10 = sshll.u32 (%p1628_p4), %s1616_s15, 8 }
  0x14   : > { %s1113_s27 = sshll.u32 %s179_s26, 2  ;;  %p777_p8 = scmp.lt.s32.totalorder (%p1628_p4), %s776_s9, 32 }
  0x15   : > { %s1646_s30 = scalar_lea.vmem %s1921_s0, %s1113_s27  ;;  %s1789_s14 = scalar_lea.vmem (%p1628_p4), %s1924_s3, %s1198_s10  }
  0x16   : > { %v1350_v6 = vld [vmem:[%s1646_s30] sm:$0xff]   ;;  %v1352_v8 = vld [vmem:[%s1646_s30 + $0x8] sm:$0xff]   ;;  %v1354_v10 = vld [vmem:[%s1646_s30 + $0x10] sm:$0xff]  }
  0x17   : > { %v1351_v7 = vld [vmem:[%s1646_s30 + $0x40] sm:$0xff]   ;;  %1223 = vmatprep.mubr.msk.bf16.mxu0 %vm327_vm2, %v1350_v6  ;;  %v1353_v9 = vld [vmem:[%s1646_s30 + $0x48] sm:$0xff]   ;;  %v1355_v11 = vld [vmem:[%s1646_s30 + $0x50] sm:$0xff]  }
  0x18   : > { %1239 = vmatprep.mubr.msk.bf16.mxu1 %vm327_vm2, %v1351_v7  ;;  %1224 = vmatmul.mubr.msk.bf16.vlgmr.msra.gmra.mrb[0].mxu0 %vm327_vm2, %v1352_v8  ;;  %v1356_v12 = vld [vmem:[%s1646_s30 + $0x18] sm:$0xff]   ;;  %v1358_v14 = vld [vmem:[%s1646_s30 + $0x20] sm:$0xff]   ;;  %v1360_v16 = vld [vmem:[%s1646_s30 + $0x28] sm:$0xff]  }
  0x19   : > { %1240 = vmatmul.mubr.msk.bf16.vlgmr.msra.gmra.mrb[0].mxu1 %vm327_vm2, %v1353_v9  ;;  %1227 = vmatprep.mubr.msk.bf16.mxu0 %vm327_vm2, %v1354_v10  ;;  %v1357_v13 = vld [vmem:[%s1646_s30 + $0x58] sm:$0xff]   ;;  %v1359_v15 = vld [vmem:[%s1646_s30 + $0x60] sm:$0xff]   ;;  %v1361_v17 = vld [vmem:[%s1646_s30 + $0x68] sm:$0xff]  }
  0x1a   : > { %1243 = vmatprep.mubr.msk.bf16.mxu1 %vm327_vm2, %v1355_v11  ;;  %v1362_v18 = vld [vmem:[%s1646_s30 + $0x30] sm:$0xff]   ;;  %v1364_v20 = vld [vmem:[%s1646_s30 + $0x38] sm:$0xff]  }
  0x1b   : > { %v1363_v19 = vld [vmem:[%s1646_s30 + $0x70] sm:$0xff]   ;;  %v1365_v21 = vld [vmem:[%s1646_s30 + $0x78] sm:$0xff]  }
  0x20   : > { %1228 = vmatmul.mubr.msk.bf16.gmra.mrb[4].mxu0 %vm327_vm2, %v1356_v12 }
  0x21   : > { %1244 = vmatmul.mubr.msk.bf16.gmra.mrb[4].mxu1 %vm327_vm2, %v1357_v13  ;;  %1231 = vmatprep.mubr.msk.bf16.mxu0 %vm327_vm2, %v1358_v14 }
  0x22   : > { %1247 = vmatprep.mubr.msk.bf16.mxu1 %vm327_vm2, %v1359_v15 }
  0x28   : > { %1232 = vmatmul.mubr.msk.bf16.gmra.mrb[8].mxu0 %vm327_vm2, %v1360_v16 }
  0x29   : > { %1248 = vmatmul.mubr.msk.bf16.gmra.mrb[8].mxu1 %vm327_vm2, %v1361_v17  ;;  %1235 = vmatprep.mubr.msk.bf16.mxu0 %vm327_vm2, %v1362_v18 }
  0x2a   : > { %1251 = vmatprep.mubr.msk.bf16.mxu1 %vm327_vm2, %v1363_v19 }
  0x30   : > { %1236 = vmatmul.mubr.msk.bf16.gmra.mrb[12].mxu0 %vm327_vm2, %v1364_v20 }
  0x31   : > { %1252 = vmatmul.mubr.msk.bf16.gmra.mrb[12].mxu1 %vm327_vm2, %v1365_v21 }
  0xeb   : > { %v1225_v23 = vpop.f32.mrb[0].mxu0 }
  0xec   : > { %v426_v24 = vadd.f32 %v1225_v23, %v1683_v22  ;;  %v1241_v25 = vpop.f32.mrb[0].mxu1  ;;  %v417_v26 = vpop.f32.mrb[1].mxu0 }
  0xed   : > { %v490_v27 = vadd.f32 %v1241_v25, %v1683_v22  ;;  %v418_v28 = vadd.f32 %v1683_v22, %v417_v26  ;;  %v481_v29 = vpop.f32.mrb[1].mxu1  ;;  %v1226_v30 = vpop.f32.mrb[2].mxu0 }
  0xee   : > { %v1151_v31 = vmul.f32 -1.442695, %v426_v24  ;;  %v482_v32 = vadd.f32 %v1683_v22, %v481_v29  ;;  %v429_v33 = vadd.f32 %v1226_v30, %v1683_v22  ;;  %v1242_v34 = vpop.f32.mrb[2].mxu1  ;;  %v420_v35 = vpop.f32.mrb[3].mxu0 }
  0xef   : > { %v1167_v36 = vmul.f32 -1.442695, %v490_v27  ;;  %v1149_v37 = vmul.f32 -1.442695, %v418_v28  ;;  %v493_v38 = vadd.f32 %v1242_v34, %v1683_v22  ;;  %v421_v39 = vadd.f32 %v1683_v22, %v420_v35  ;;  %v484_v40 = vpop.f32.mrb[3].mxu1 }
  0xf0   : > { %1366 = vpow2.f32 %v1151_v31  ;;  %v1165_v41 = vmul.f32 -1.442695, %v482_v32  ;;  %v1152_v42 = vmul.f32 -1.442695, %v429_v33  ;;  %v485_v43 = vadd.f32 %v1683_v22, %v484_v40 }
  0xf1   : > { %1368 = vpow2.f32 %v1167_v36  ;;  %v1168_v44 = vmul.f32 -1.442695, %v493_v38  ;;  %v1150_v45 = vmul.f32 -1.442695, %v421_v39 }
  0xf2   : > { %1370 = vpow2.f32 %v1149_v37  ;;  %v1166_v46 = vmul.f32 -1.442695, %v485_v43 }
  0xf3   : > { %1372 = vpow2.f32 %v1165_v41  ;;  %v1229_v47 = vpop.f32.mrb[4].mxu0 }
  0xf4   : > { %1374 = vpow2.f32 %v1152_v42  ;;  %v442_v48 = vadd.f32 %v1229_v47, %v1683_v22  ;;  %v1245_v49 = vpop.f32.mrb[4].mxu1  ;;  %v433_v50 = vpop.f32.mrb[5].mxu0 }
  0xf5   : > { %1376 = vpow2.f32 %v1168_v44  ;;  %v506_v51 = vadd.f32 %v1245_v49, %v1683_v22  ;;  %v434_v52 = vadd.f32 %v1683_v22, %v433_v50  ;;  %v497_v53 = vpop.f32.mrb[5].mxu1  ;;  %v1230_v54 = vpop.f32.mrb[6].mxu0 }
  0xf6   : > { %1378 = vpow2.f32 %v1150_v45  ;;  %v1155_v55 = vmul.f32 -1.442695, %v442_v48  ;;  %v498_v56 = vadd.f32 %v1683_v22, %v497_v53  ;;  %v445_v57 = vadd.f32 %v1230_v54, %v1683_v22  ;;  %v1246_v58 = vpop.f32.mrb[6].mxu1  ;;  %v436_v59 = vpop.f32.mrb[7].mxu0 }
  0xf7   : > { %1380 = vpow2.f32 %v1166_v46  ;;  %v1171_v60 = vmul.f32 -1.442695, %v506_v51  ;;  %v1153_v61 = vmul.f32 -1.442695, %v434_v52  ;;  %v500_v62 = vpop.f32.mrb[7].mxu1  ;;  %v509_v27 = vadd.f32 %v1246_v58, %v1683_v22 }
  0xf8   : > { %1382 = vpow2.f32 %v1155_v55  ;;  %v1169_v63 = vmul.f32 -1.442695, %v498_v56  ;;  %v1156_v0 = vmul.f32 -1.442695, %v445_v57  ;;  %v437_v30 = vadd.f32 %v1683_v22, %v436_v59 }
  0xf9   : > { %1384 = vpow2.f32 %v1171_v60  ;;  %v501_v34 = vadd.f32 %v1683_v22, %v500_v62  ;;  %v1172_v44 = vmul.f32 -1.442695, %v509_v27 }
  0xfa   : > { %v1367_v1 = vpop.eup %1366  ;;  %1386 = vpow2.f32 %v1153_v61  ;;  %v1154_v50 = vmul.f32 -1.442695, %v437_v30 }
  0xfb   : > { %v1369_v2 = vpop.eup %1368  ;;  %v642_v3 = vadd.f32 1.0, %v1367_v1  ;;  %1388 = vpow2.f32 %v1169_v63  ;;  %v1233_v4 = vpop.f32.mrb[8].mxu0  ;;  %v1170_v54 = vmul.f32 -1.442695, %v501_v34 }
  0xfc   : > { %v1371_v5 = vpop.eup %1370  ;;  %v658_v6 = vadd.f32 1.0, %v1369_v2  ;;  %1390 = vpow2.f32 %v1156_v0  ;;  %v1249_v7 = vpop.f32.mrb[8].mxu1  ;;  %v458_v39 = vadd.f32 %v1233_v4, %v1683_v22 }
  0xfd   : > { %v449_v8 = vpop.f32.mrb[9].mxu0  ;;  %v1373_v9 = vpop.eup %1372  ;;  %1392 = vrcp.f32 %v642_v3  ;;  %v640_v10 = vadd.f32 1.0, %v1371_v5  ;;  %v522_v45 = vadd.f32 %v1249_v7, %v1683_v22 }
  0xfe   : > { %v513_v11 = vpop.f32.mrb[9].mxu1  ;;  %v1234_v12 = vpop.f32.mrb[10].mxu0  ;;  %1394 = vrcp.f32 %v658_v6  ;;  %v656_v14 = vadd.f32 1.0, %v1373_v9  ;;  %v450_v51 = vadd.f32 %v1683_v22, %v449_v8  ;;  %v1159_v57 = vmul.f32 -1.442695, %v458_v39 }
  0xff   : > { %v1375_v13 = vpop.eup %1374  ;;  %v1698_v15 = vpop.f32.mrb[10].mxu1  ;;  %1396 = vrcp.f32 %v640_v10  ;;  %v514_v55 = vadd.f32 %v1683_v22, %v513_v11  ;;  %v461_v58 = vadd.f32 %v1234_v12, %v1683_v22  ;;  %v1175_v60 = vmul.f32 -1.442695, %v522_v45 }
 0x100   : > { %v1700_v16 = vpop.f32.mrb[11].mxu0  ;;  %v1377_v17 = vpop.eup %1376  ;;  %v643_v18 = vadd.f32 1.0, %v1375_v13  ;;  %1398 = vrcp.f32 %v656_v14  ;;  %v525_v61 = vadd.f32 %v1698_v15, %v1683_v22  ;;  %v1157_v63 = vmul.f32 -1.442695, %v450_v51 }
 0x101   : > { %v1703_v19 = vpop.f32.mrb[11].mxu1  ;;  %v1379_v20 = vpop.eup %1378  ;;  %v659_v21 = vadd.f32 1.0, %v1377_v17  ;;  %v453_v0 = vadd.f32 %v1683_v22, %v1700_v16  ;;  %v1173_v2 = vmul.f32 -1.442695, %v514_v55  ;;  %v1160_v5 = vmul.f32 -1.442695, %v461_v58 }
 0x102   : > { %v1381_v23 = vpop.eup %1380  ;;  %1400 = vrcp.f32 %v643_v18  ;;  %v641_v24 = vadd.f32 1.0, %v1379_v20  ;;  %v517_v3 = vadd.f32 %v1683_v22, %v1703_v19  ;;  %v1176_v8 = vmul.f32 -1.442695, %v525_v61 }
 0x103   : > { %v1383_v25 = vpop.eup %1382  ;;  %1402 = vrcp.f32 %v659_v21  ;;  %v657_v26 = vadd.f32 1.0, %v1381_v23  ;;  %v1237_v31 = vpop.f32.mrb[12].mxu0  ;;  %v1158_v11 = vmul.f32 -1.442695, %v453_v0 }
 0x104   : > { %v1385_v28 = vpop.eup %1384  ;;  %1404 = vrcp.f32 %v641_v24  ;;  %v646_v29 = vadd.f32 1.0, %v1383_v25  ;;  %v1253_v35 = vpop.f32.mrb[12].mxu1  ;;  %v474_v6 = vadd.f32 %v1237_v31, %v1683_v22  ;;  %v1174_v13 = vmul.f32 -1.442695, %v517_v3 }
 0x105   : > { %v1387_v32 = vpop.eup %1386  ;;  %1406 = vrcp.f32 %v657_v26  ;;  %v662_v33 = vadd.f32 1.0, %v1385_v28  ;;  %v1710_v36 = vpop.f32.mrb[13].mxu0  ;;  %v538_v9 = vadd.f32 %v1253_v35, %v1683_v22 }
 0x106   : > { %v1389_v37 = vpop.eup %1388  ;;  %1408 = vrcp.f32 %v646_v29  ;;  %v644_v38 = vadd.f32 1.0, %v1387_v32  ;;  %v1713_v40 = vpop.f32.mrb[13].mxu1  ;;  %v1163_v15 = vmul.f32 -1.442695, %v474_v6 }
 0x107   : > { %v1715_v41 = vpop.f32.mrb[14].mxu0  ;;  %v1391_v42 = vpop.eup %1390  ;;  %1410 = vrcp.f32 %v662_v33  ;;  %v660_v43 = vadd.f32 1.0, %v1389_v37  ;;  %v1179_v17 = vmul.f32 -1.442695, %v538_v9 }
 0x108   : > { %v1718_v46 = vpop.f32.mrb[14].mxu1  ;;  %v1720_v47 = vpop.f32.mrb[15].mxu0  ;;  %1412 = vrcp.f32 %v644_v38  ;;  %v647_v49 = vadd.f32 1.0, %v1391_v42  ;;  %v466_v38 = vadd.f32 %v1683_v22, %v1710_v36 }
 0x109   : > { %v1393_v48 = vpop.eup %1392  ;;  %v1723_v52 = vpop.f32.mrb[15].mxu1  ;;  %1414 = vrcp.f32 %v660_v43  ;;  %v530_v43 = vadd.f32 %v1683_v22, %v1713_v40  ;;  %v541_v51 = vadd.f32 %v1718_v46, %v1683_v22  ;;  %v469_v40 = vadd.f32 %v1683_v22, %v1720_v47 }
 0x10a   : > { %v1395_v53 = vpop.eup %1394  ;;  %738 = vst [vmem:[%s1726_s8 + $0x10] sm:$0xff] %v1393_v48  ;;  %1416 = vrcp.f32 %v647_v49  ;;  %v477_v48 = vadd.f32 %v1715_v41, %v1683_v22 }
 0x10b   : > { %v1397_v56 = vpop.eup %1396  ;;  %754 = vst [vmem:[%s1726_s8 + $0x90] sm:$0xff] %v1395_v53  ;;  %1418 = vpow2.f32 %v1172_v44  ;;  %v1177_v41 = vmul.f32 -1.442695, %v530_v43  ;;  %v1162_v61 = vmul.f32 -1.442695, %v469_v40 }
 0x10c   : > { %v1399_v59 = vpop.eup %1398  ;;  %736 = vst [vmem:[%s1726_s8] sm:$0xff] %v1397_v56  ;;  %1420 = vpow2.f32 %v1154_v50  ;;  %v1164_v46 = vmul.f32 -1.442695, %v477_v48 }
 0x10d   : > { %v1401_v62 = vpop.eup %1400  ;;  %752 = vst [vmem:[%s1726_s8 + $0x80] sm:$0xff] %v1399_v59  ;;  %1422 = vpow2.f32 %v1170_v54  ;;  %v1161_v54 = vmul.f32 -1.442695, %v466_v38 }
 0x10e   : > { %v1403_v1 = vpop.eup %1402  ;;  %739 = vst [vmem:[%s1726_s8 + $0x18] sm:$0xff] %v1401_v62  ;;  %1424 = vpow2.f32 %v1159_v57  ;;  %v533_v57 = vadd.f32 %v1683_v22, %v1723_v52 }
 0x10f   : > { %v1405_v4 = vpop.eup %1404  ;;  %755 = vst [vmem:[%s1726_s8 + $0x98] sm:$0xff] %v1403_v1  ;;  %1426 = vpow2.f32 %v1175_v60  ;;  %v1180_v60 = vmul.f32 -1.442695, %v541_v51 }
 0x110   : > { %v1407_v7 = vpop.eup %1406  ;;  %737 = vst [vmem:[%s1726_s8 + $0x8] sm:$0xff] %v1405_v4  ;;  %1428 = vpow2.f32 %v1157_v63  ;;  %v1178_v22 = vmul.f32 -1.442695, %v533_v57 }
 0x111   : > { %v1409_v10 = vpop.eup %1408  ;;  %753 = vst [vmem:[%s1726_s8 + $0x88] sm:$0xff] %v1407_v7  ;;  %1430 = vpow2.f32 %v1173_v2 }
 0x112   : > { %v1411_v12 = vpop.eup %1410  ;;  %742 = vst [vmem:[%s1726_s8 + $0x30] sm:$0xff] %v1409_v10  ;;  %1432 = vpow2.f32 %v1160_v5 }
 0x113   : > { %v1413_v14 = vpop.eup %1412  ;;  %758 = vst [vmem:[%s1726_s8 + $0xb0] sm:$0xff] %v1411_v12  ;;  %1434 = vpow2.f32 %v1176_v8 }
 0x114   : > { %v1415_v16 = vpop.eup %1414  ;;  %740 = vst [vmem:[%s1726_s8 + $0x20] sm:$0xff] %v1413_v14  ;;  %1436 = vpow2.f32 %v1158_v11 }
 0x115   : > { %v1417_v18 = vpop.eup %1416  ;;  %756 = vst [vmem:[%s1726_s8 + $0xa0] sm:$0xff] %v1415_v16  ;;  %1438 = vpow2.f32 %v1174_v13 }
 0x116   : > { %v1419_v19 = vpop.eup %1418  ;;  %743 = vst [vmem:[%s1726_s8 + $0x38] sm:$0xff] %v1417_v18  ;;  %1440 = vpow2.f32 %v1163_v15 }
 0x117   : > { %v1421_v20 = vpop.eup %1420  ;;  %v663_v21 = vadd.f32 1.0, %v1419_v19  ;;  %1442 = vpow2.f32 %v1179_v17 }
 0x118   : > { %v1423_v23 = vpop.eup %1422  ;;  %v645_v24 = vadd.f32 1.0, %v1421_v20 }
 0x119   : > { %v1425_v25 = vpop.eup %1424  ;;  %1444 = vrcp.f32 %v663_v21  ;;  %v661_v26 = vadd.f32 1.0, %v1423_v23 }
 0x11a   : > { %v1427_v27 = vpop.eup %1426  ;;  %1446 = vrcp.f32 %v645_v24  ;;  %v650_v28 = vadd.f32 1.0, %v1425_v25 }
 0x11b   : > { %v1429_v29 = vpop.eup %1428  ;;  %1448 = vrcp.f32 %v661_v26  ;;  %v666_v30 = vadd.f32 1.0, %v1427_v27 }
 0x11c   : > { %v1431_v31 = vpop.eup %1430  ;;  %1450 = vrcp.f32 %v650_v28  ;;  %v648_v32 = vadd.f32 1.0, %v1429_v29 }
 0x11d   : > { %v1433_v33 = vpop.eup %1432  ;;  %1452 = vrcp.f32 %v666_v30  ;;  %v664_v34 = vadd.f32 1.0, %v1431_v31 }
 0x11e   : > { %v1435_v35 = vpop.eup %1434  ;;  %1454 = vrcp.f32 %v648_v32  ;;  %v651_v37 = vadd.f32 1.0, %v1433_v33 }
 0x11f   : > { %v1437_v39 = vpop.eup %1436  ;;  %1456 = vrcp.f32 %v664_v34  ;;  %v667_v42 = vadd.f32 1.0, %v1435_v35 }
 0x120   : > { %v1439_v44 = vpop.eup %1438  ;;  %1458 = vrcp.f32 %v651_v37  ;;  %v649_v45 = vadd.f32 1.0, %v1437_v39 }
 0x121   : > { %v1441_v49 = vpop.eup %1440  ;;  %1460 = vrcp.f32 %v667_v42  ;;  %v665_v50 = vadd.f32 1.0, %v1439_v44 }
 0x122   : > { %v1443_v36 = vpop.eup %1442  ;;  %1462 = vrcp.f32 %v649_v45  ;;  %v654_v53 = vadd.f32 1.0, %v1441_v49 }
 0x123   : > { %v1445_v55 = vpop.eup %1444  ;;  %1464 = vrcp.f32 %v665_v50  ;;  %v670_v56 = vadd.f32 1.0, %v1443_v36 }
 0x124   : > { %v1447_v58 = vpop.eup %1446  ;;  %759 = vst [vmem:[%s1726_s8 + $0xb8] sm:$0xff] %v1445_v55  ;;  %1466 = vrcp.f32 %v654_v53 }
 0x125   : > { %v1449_v59 = vpop.eup %1448  ;;  %741 = vst [vmem:[%s1726_s8 + $0x28] sm:$0xff] %v1447_v58  ;;  %1468 = vrcp.f32 %v670_v56 }
 0x126   : > { %v1451_v47 = vpop.eup %1450  ;;  %757 = vst [vmem:[%s1726_s8 + $0xa8] sm:$0xff] %v1449_v59  ;;  %1470 = vpow2.f32 %v1161_v54 }
 0x127   : > { %v1453_v62 = vpop.eup %1452  ;;  %746 = vst [vmem:[%s1726_s8 + $0x50] sm:$0xff] %v1451_v47  ;;  %1472 = vpow2.f32 %v1177_v41 }
 0x128   : > { %v1455_v52 = vpop.eup %1454  ;;  %762 = vst [vmem:[%s1726_s8 + $0xd0] sm:$0xff] %v1453_v62  ;;  %1474 = vpow2.f32 %v1164_v46 }
 0x129   : > { %v1457_v63 = vpop.eup %1456  ;;  %744 = vst [vmem:[%s1726_s8 + $0x40] sm:$0xff] %v1455_v52  ;;  %1476 = vpow2.f32 %v1180_v60 }
 0x12a   : > { %v1459_v0 = vpop.eup %1458  ;;  %760 = vst [vmem:[%s1726_s8 + $0xc0] sm:$0xff] %v1457_v63  ;;  %1478 = vpow2.f32 %v1162_v61 }
 0x12b   : > { %v1461_v1 = vpop.eup %1460  ;;  %747 = vst [vmem:[%s1726_s8 + $0x58] sm:$0xff] %v1459_v0  ;;  %1480 = vpow2.f32 %v1178_v22 }
 0x12c   : > { %v1463_v2 = vpop.eup %1462  ;;  %763 = vst [vmem:[%s1726_s8 + $0xd8] sm:$0xff] %v1461_v1 }
 0x12d   : > { %v1465_v3 = vpop.eup %1464  ;;  %745 = vst [vmem:[%s1726_s8 + $0x48] sm:$0xff] %v1463_v2 }
 0x12e   : > { %v1467_v4 = vpop.eup %1466  ;;  %761 = vst [vmem:[%s1726_s8 + $0xc8] sm:$0xff] %v1465_v3 }
 0x12f   : > { %v1469_v5 = vpop.eup %1468  ;;  %750 = vst [vmem:[%s1726_s8 + $0x70] sm:$0xff] %v1467_v4 }
 0x130   : > { %v1471_v6 = vpop.eup %1470  ;;  %766 = vst [vmem:[%s1726_s8 + $0xf0] sm:$0xff] %v1469_v5 }
 0x131   : > { %v1473_v7 = vpop.eup %1472  ;;  %v652_v8 = vadd.f32 1.0, %v1471_v6 }
 0x132   : > { %v1475_v9 = vpop.eup %1474  ;;  %v668_v10 = vadd.f32 1.0, %v1473_v7 }
 0x133   : > { %v1477_v11 = vpop.eup %1476  ;;  %1482 = vrcp.f32 %v652_v8  ;;  %v655_v12 = vadd.f32 1.0, %v1475_v9 }
 0x134   : > { %v1479_v13 = vpop.eup %1478  ;;  %1484 = vrcp.f32 %v668_v10  ;;  %v671_v14 = vadd.f32 1.0, %v1477_v11 }
 0x135   : > { %v1481_v15 = vpop.eup %1480  ;;  %1486 = vrcp.f32 %v655_v12  ;;  %v653_v16 = vadd.f32 1.0, %v1479_v13 }
 0x136   : > { %1488 = vrcp.f32 %v671_v14  ;;  %v669_v17 = vadd.f32 1.0, %v1481_v15 }
 0x137   : > { %1490 = vrcp.f32 %v653_v16 }
 0x138   : > { %1492 = vrcp.f32 %v669_v17 }
 0x13d   : > { %v1483_v18 = vpop.eup %1482  ;;  %774 = sbr.rel (!%p1628_p4) target bundleno = 380 (0x17c), region = 36 }
 0x13e   : > { %v1485_v19 = vpop.eup %1484  ;;  %748 = vst [vmem:[%s1726_s8 + $0x60] sm:$0xff] %v1483_v18 }
 0x13f   : > { %v1487_v20 = vpop.eup %1486  ;;  %764 = vst [vmem:[%s1726_s8 + $0xe0] sm:$0xff] %v1485_v19 }
 0x140   : > { %v1489_v21 = vpop.eup %1488  ;;  %751 = vst [vmem:[%s1726_s8 + $0x78] sm:$0xff] %v1487_v20 }
 0x141   : > { %v1491_v23 = vpop.eup %1490  ;;  %767 = vst [vmem:[%s1726_s8 + $0xf8] sm:$0xff] %v1489_v21 }
 0x142   : > { %v1493_v24 = vpop.eup %1492  ;;  %749 = vst [vmem:[%s1726_s8 + $0x68] sm:$0xff] %v1491_v23 }
 0x143   : > { %765 = vst [vmem:[%s1726_s8 + $0xe8] sm:$0xff] %v1493_v24 }
 0x144   : > { %s1935_s9 = smov (!%p777_p8, %s776_s9), 32 }
 0x145   : > { %s1183_s17 = sshll.u32 %s1935_s9, 7 }
 0x146   : > { %p1186_p9 = scmp.eq.s32.totalorder %s1183_s17, 0 }
 0x147   : > { %s1795_s18 = sshrl.u32 (!%p1186_p9), %s1935_s9, 5 }
 0x148   : > { %785 = sbr.rel (%p1186_p9) target bundleno = 380 (0x17c), region = 40  ;;  %p1187_p10 = scmp.le.s32.totalorder (!%p1186_p9), %s1795_s18, 0 }
 0x14f   : > { %1063 = sbr.rel (%p1187_p10) target bundleno = 359 (0x167), region = 116  ;;  %s1926_s15 = smov (!%p1187_p10), %s1789_s14 }
 0x150   : > { %s1927_s20 = smov (!%p1187_p10), %s1726_s8  ;;  %s1804_s21 = smov (!%p1187_p10), 0  }
 0x151   : > { %s1806_s22 = smov (!%p1187_p10), 0  }
 0x156 LB: >> { %v909_v25 = vld [vmem:[%s1556_s20] sm:$0xff]  ;;  %v911_v26 = vld [vmem:[%s1556_s20 + $0x8] sm:$0xff]  ;;  %v913_v27 = vld [vmem:[%s1556_s20 + $0x10] sm:$0xff]  ;;  %s973_s23 = sadd.s32 1, %s1560_s21  ;;  %s903_s22 = sadd.s32 1, %s1564_s22   ;;  %s1564_s22 = sphi %s1806_s22, %s903_s22   ;;  %s1560_s21 = sphi %s1804_s21, %s1930_s21   ;;  %s1556_s20 = sphi %s1927_s20, %s1929_s20   ;;  %s1552_s15 = sphi %s1926_s15, %s1928_s15  }
 0x157   : >> { %910 = vst [vmem:[%s1552_s15] sm:$0xff] %v909_v25  ;;  %912 = vst [vmem:[%s1552_s15 + $0x8] sm:$0xff] %v911_v26  ;;  %v915_v28 = vld [vmem:[%s1556_s20 + $0x18] sm:$0xff]  ;;  %v917_v29 = vld [vmem:[%s1556_s20 + $0x20] sm:$0xff]  ;;  %p974_p11 = scmp.ge.s32.totalorder %s973_s23, %s1795_s18  ;;  %p902_p12 = scmp.ge.s32.totalorder %s903_s22, %s1795_s18 }
 0x158   : >> { %914 = vst [vmem:[%s1552_s15 + $0x10] sm:$0xff] %v913_v27  ;;  %v919_v30 = vld [vmem:[%s1556_s20 + $0x28] sm:$0xff]  ;;  %916 = vst [vmem:[%s1552_s15 + $0x18] sm:$0xff] %v915_v28  ;;  %v921_v31 = vld [vmem:[%s1556_s20 + $0x30] sm:$0xff] }
 0x159   : >> { %918 = vst [vmem:[%s1552_s15 + $0x20] sm:$0xff] %v917_v29  ;;  %920 = vst [vmem:[%s1552_s15 + $0x28] sm:$0xff] %v919_v30  ;;  %v923_v32 = vld [vmem:[%s1556_s20 + $0x38] sm:$0xff]  ;;  %v925_v33 = vld [vmem:[%s1556_s20 + $0x40] sm:$0xff]  ;;  %s1937_s23 = smov (%p974_p11, %s973_s23), 0 }
 0x15a   : >> { %922 = vst [vmem:[%s1552_s15 + $0x30] sm:$0xff] %v921_v31  ;;  %924 = vst [vmem:[%s1552_s15 + $0x38] sm:$0xff] %v923_v32  ;;  %v927_v34 = vld [vmem:[%s1556_s20 + $0x48] sm:$0xff]  ;;  %v929_v35 = vld [vmem:[%s1556_s20 + $0x50] sm:$0xff]  ;;  %s1188_s24 = sshll.u32 %s1937_s23, 8  ;;  %s1930_s21 = smov %s1937_s23 }
 0x15b   : >> { %926 = vst [vmem:[%s1552_s15 + $0x40] sm:$0xff] %v925_v33  ;;  %v931_v37 = vld [vmem:[%s1556_s20 + $0x58] sm:$0xff]  ;;  %928 = vst [vmem:[%s1552_s15 + $0x48] sm:$0xff] %v927_v34  ;;  %v933_v38 = vld [vmem:[%s1556_s20 + $0x60] sm:$0xff]  ;;  %s1862_s25 = scalar_lea.vmem %s1726_s8, %s1188_s24 [#allocation2]   ;;  %s979_s26 = scalar_lea.vmem %s1789_s14, %s1188_s24  }
 0x15c   : >> { %930 = vst [vmem:[%s1552_s15 + $0x50] sm:$0xff] %v929_v35  ;;  %932 = vst [vmem:[%s1552_s15 + $0x58] sm:$0xff] %v931_v37  ;;  %v935_v39 = vld [vmem:[%s1556_s20 + $0x68] sm:$0xff]  ;;  %v937_v42 = vld [vmem:[%s1556_s20 + $0x70] sm:$0xff] }
 0x15d   : >> { %934 = vst [vmem:[%s1552_s15 + $0x60] sm:$0xff] %v933_v38  ;;  %936 = vst [vmem:[%s1552_s15 + $0x68] sm:$0xff] %v935_v39  ;;  %v939_v43 = vld [vmem:[%s1556_s20 + $0x78] sm:$0xff]  ;;  %v941_v44 = vld [vmem:[%s1556_s20 + $0x80] sm:$0xff] }
 0x15e   : >> { %938 = vst [vmem:[%s1552_s15 + $0x70] sm:$0xff] %v937_v42  ;;  %v943_v45 = vld [vmem:[%s1556_s20 + $0x88] sm:$0xff]  ;;  %940 = vst [vmem:[%s1552_s15 + $0x78] sm:$0xff] %v939_v43  ;;  %v945_v48 = vld [vmem:[%s1556_s20 + $0x90] sm:$0xff] }
 0x15f   : >> { %942 = vst [vmem:[%s1552_s15 + $0x80] sm:$0xff] %v941_v44  ;;  %944 = vst [vmem:[%s1552_s15 + $0x88] sm:$0xff] %v943_v45  ;;  %v947_v49 = vld [vmem:[%s1556_s20 + $0x98] sm:$0xff]  ;;  %v949_v50 = vld [vmem:[%s1556_s20 + $0xa0] sm:$0xff] }
 0x160   : >> { %946 = vst [vmem:[%s1552_s15 + $0x90] sm:$0xff] %v945_v48  ;;  %948 = vst [vmem:[%s1552_s15 + $0x98] sm:$0xff] %v947_v49  ;;  %v951_v51 = vld [vmem:[%s1556_s20 + $0xa8] sm:$0xff]  ;;  %v953_v36 = vld [vmem:[%s1556_s20 + $0xb0] sm:$0xff]  ;;  %905 = sbr.rel (!%p902_p12) target bundleno = 342 (0x156), region = 122 }
 0x161   : >> { %950 = vst [vmem:[%s1552_s15 + $0xa0] sm:$0xff] %v949_v50  ;;  %v955_v53 = vld [vmem:[%s1556_s20 + $0xb8] sm:$0xff]  ;;  %952 = vst [vmem:[%s1552_s15 + $0xa8] sm:$0xff] %v951_v51  ;;  %v957_v54 = vld [vmem:[%s1556_s20 + $0xc0] sm:$0xff] }
 0x162   : >> { %954 = vst [vmem:[%s1552_s15 + $0xb0] sm:$0xff] %v953_v36  ;;  %956 = vst [vmem:[%s1552_s15 + $0xb8] sm:$0xff] %v955_v53  ;;  %v959_v40 = vld [vmem:[%s1556_s20 + $0xc8] sm:$0xff]  ;;  %v961_v55 = vld [vmem:[%s1556_s20 + $0xd0] sm:$0xff] }
 0x163   : >> { %958 = vst [vmem:[%s1552_s15 + $0xc0] sm:$0xff] %v957_v54  ;;  %960 = vst [vmem:[%s1552_s15 + $0xc8] sm:$0xff] %v959_v40  ;;  %v963_v56 = vld [vmem:[%s1556_s20 + $0xd8] sm:$0xff]  ;;  %v965_v41 = vld [vmem:[%s1556_s20 + $0xe0] sm:$0xff] }
 0x164   : >> { %962 = vst [vmem:[%s1552_s15 + $0xd0] sm:$0xff] %v961_v55  ;;  %v967_v57 = vld [vmem:[%s1556_s20 + $0xe8] sm:$0xff]  ;;  %964 = vst [vmem:[%s1552_s15 + $0xd8] sm:$0xff] %v963_v56  ;;  %v969_v58 = vld [vmem:[%s1556_s20 + $0xf0] sm:$0xff] }
 0x165   : >> { %966 = vst [vmem:[%s1552_s15 + $0xe0] sm:$0xff] %v965_v41  ;;  %968 = vst [vmem:[%s1552_s15 + $0xe8] sm:$0xff] %v967_v57  ;;  %v971_v46 = vld [vmem:[%s1556_s20 + $0xf8] sm:$0xff]  ;;  %s1929_s20 = smov %s1862_s25 }
 0x166   : >> { %970 = vst [vmem:[%s1552_s15 + $0xf0] sm:$0xff] %v969_v58  ;;  %972 = vst [vmem:[%s1552_s15 + $0xf8] sm:$0xff] %v971_v46  ;;  %s1928_s15 = smov %s979_s26 }
 0x167 PF: > { %s1903_s27 = sand.u32 31, %s1935_s9   ;;  %s1199_s28 = sshll.u32 %s1795_s18, 8 }
 0x168   : > { %s984_s29 = scalar_lea.vmem %s1726_s8, %s1199_s28 [#allocation2]   ;;  %s986_s30 = scalar_lea.vmem %s1789_s14, %s1199_s28  }
 0x169   : > { %p1193_p13 = scmp.le.s32.totalorder %s1903_s27, 0 }
 0x16a   : > { %s1566_s4 = smov (!%p1193_p13), %s986_s30   ;;  %s1570_s5 = smov (!%p1193_p13), %s984_s29  }
 0x16b   : > { %1077 = sbr.rel (%p1193_p13) target bundleno = 380 (0x17c), region = 127  ;;  %s1574_s6 = smov (!%p1193_p13), 0  }
 0x16c   : > { %s1578_s7 = smov (!%p1193_p13), 0  }
 0x172 LB: >> { %v996_v59 = vld [vmem:[%s1572_s5] sm:$0xff]  ;;  %s998_s9 = sadd.s32 1, %s1576_s6  ;;  %s990_s7 = sadd.s32 1, %s1580_s7   ;;  %s1580_s7 = sphi %s1578_s7, %s990_s7   ;;  %s1576_s6 = sphi %s1574_s6, %s1575_s6   ;;  %s1572_s5 = sphi %s1570_s5, %s1003_s5   ;;  %s1568_s4 = sphi %s1566_s4, %s1004_s4  }
 0x173   : >> { %997 = vst [vmem:[%s1568_s4] sm:$0xff] %v996_v59  ;;  %p999_p0 = scmp.ge.s32.totalorder %s998_s9, %s1903_s27  ;;  %p989_p1 = scmp.ge.s32.totalorder %s990_s7, %s1903_s27 }
 0x175   : >> { %s1939_s9 = smov (%p999_p0, %s998_s9), 0  ;;  %992 = sbr.rel (!%p989_p1) target bundleno = 370 (0x172), region = 133 }
 0x176   : >> { %s1194_s8 = sshll.u32 %s1939_s9, 3  ;;  %s1575_s6 = smov %s1939_s9  }
 0x177   : >> { %s1003_s5 = scalar_lea.vmem %s984_s29, %s1194_s8 [#allocation2]   ;;  %s1004_s4 = scalar_lea.vmem %s986_s30, %s1194_s8  }
 0x17c PF: > { %p10_p2 = scmp.ge.s32.totalorder %s1618_s16, 9   ;;  %s1931_s12 = smov %s1544_s13 }
 0x17d   : > { %s1932_s13 = smov %s1626_s19  ;;  %s1933_s14 = smov %s1618_s16 }
 0x17e   :  { %12 = sbr.rel (!%p10_p2) target bundleno = 2 (0x2), region = 144 }

// kernel: lenet_forward.7
= control target key start
LH: loop header
LB: loop body
LE: loop exit
PB: predicated region body
PF: predicated region fallthrough
CT: control target
= control target key end

     0   :  { %v840_v0 = vmov 0   ;;  %vm237_vm0 = vcmask 179200   ;;  %vm277_vm1 = vcmask 1042432   ;;  %s1084_s1 = inlined_call_operand.vmem [shape: bf16[150,128], index: 1, kind: input, shape index: {}]   ;;  %s1085_s0 = inlined_call_operand.vmem [shape: bf16[200,150], index: 0, kind: input, shape index: {}]   ;;  %s1086_s2 = inlined_call_operand.vmem [shape: f32[1,128], index: 2, kind: input, shape index: {}]   ;;  %s1087_s3 = inlined_call_operand.vmem [shape: f32[200,128], index: 3, kind: output, shape index: {}]  }
   0x1   :  { %281 = vmatprep.subr.bf16.mxu0 %v840_v0  ;;  %v692_v1 = vld [vmem:[%s1084_s1] sm:$0xff]   ;;  %671 = vmatprep.subr.bf16.mxu1 %v840_v0  ;;  %v693_v2 = vld [vmem:[%s1084_s1 + $0x8] sm:$0xff]   ;;  %v694_v3 = vld [vmem:[%s1084_s1 + $0x10] sm:$0xff]  }
   0x2   :  { %282 = vmatpush1.bf16.msra.mxu0 %v692_v1  ;;  %681 = vmatpush1.bf16.msra.mxu1 %v692_v1  ;;  %v695_v4 = vld [vmem:[%s1084_s1 + $0x18] sm:$0xff]   ;;  %v704_v5 = vld [vmem:[%s1085_s0 + $0x4] ss:$8 sps:$4 sm:$0xff]   ;;  %v698_v9 = vld [vmem:[%s1084_s1 + $0x30] sm:$0xff]  }
   0x3   :  { %283 = vmatprep.subr.bf16.mxu0 %v840_v0  ;;  %672 = vmatprep.subr.bf16.mxu1 %v840_v0  ;;  %v707_v6 = vld [vmem:[%s1085_s0 + $0x74] ss:$8 sps:$4 sm:$0xff]   ;;  %v696_v7 = vld [vmem:[%s1084_s1 + $0x20] sm:$0xff]   ;;  %v697_v8 = vld [vmem:[%s1084_s1 + $0x28] sm:$0xff]  }
   0x4   :  { %633 = vmatprep.mubr.msk.bf16.mxu0 %vm237_vm0, %v704_v5  ;;  %640 = vmatprep.mubr.msk.bf16.mxu1 %vm237_vm0, %v707_v6  ;;  %v699_v10 = vld [vmem:[%s1084_s1 + $0x38] sm:$0xff]   ;;  %v700_v11 = vld [vmem:[%s1084_s1 + $0x40] sm:$0xff]   ;;  %v701_v12 = vld [vmem:[%s1084_s1 + $0x48] ss:$0 sps:$4 sm:$0x77]  }
   0x5   :  { %v279_v13 = vsel %vm277_vm1, %v701_v12, 0  ;;  %v702_v14 = vld [vmem:[%s1085_s0] ss:$8 sps:$4 sm:$0xff]   ;;  %v705_v15 = vld [vmem:[%s1085_s0 + $0x70] ss:$8 sps:$4 sm:$0xff]  }
   0x6   :  { %284 = vmatpush1.bf16.msra.mxu0 %v693_v2  ;;  %682 = vmatpush1.bf16.msra.mxu1 %v693_v2  ;;  %v708_v16 = vld [vmem:[%s1085_s0 + $0x14] ss:$8 sps:$4 sm:$0xff]   ;;  %v711_v17 = vld [vmem:[%s1085_s0 + $0x84] ss:$8 sps:$4 sm:$0xff]   ;;  %v710_v18 = vld [vmem:[%s1085_s0 + $0x10] ss:$8 sps:$4 sm:$0xff]  }
   0x7   :  { %285 = vmatprep.subr.bf16.mxu0 %v840_v0  ;;  %673 = vmatprep.subr.bf16.mxu1 %v840_v0  ;;  %v715_v19 = vld [vmem:[%s1085_s0 + $0x80] ss:$8 sps:$4 sm:$0xff]   ;;  %v713_v20 = vld [vmem:[%s1085_s0 + $0x24] ss:$8 sps:$4 sm:$0xff]   ;;  %v717_v21 = vld [vmem:[%s1085_s0 + $0x94] ss:$8 sps:$4 sm:$0xff]  }
   0x8   :  { %v716_v22 = vld [vmem:[%s1085_s0 + $0x20] ss:$8 sps:$4 sm:$0xff]   ;;  %v721_v23 = vld [vmem:[%s1085_s0 + $0x90] ss:$8 sps:$4 sm:$0xff]   ;;  %v719_v24 = vld [vmem:[%s1085_s0 + $0x34] ss:$8 sps:$4 sm:$0xff]  }
   0x9   :  { %v723_v25 = vld [vmem:[%s1085_s0 + $0xa4] ss:$8 sps:$4 sm:$0xff]   ;;  %v722_v26 = vld [vmem:[%s1085_s0 + $0x30] ss:$8 sps:$4 sm:$0xff]   ;;  %v727_v27 = vld [vmem:[%s1085_s0 + $0xa0] ss:$8 sps:$4 sm:$0xff]  }
   0xa   :  { %286 = vmatpush1.bf16.msra.mxu0 %v694_v3  ;;  %683 = vmatpush1.bf16.msra.mxu1 %v694_v3  ;;  %v725_v28 = vld [vmem:[%s1085_s0 + $0x44] ss:$8 sps:$4 sm:$0xff]   ;;  %v729_v29 = vld [vmem:[%s1085_s0 + $0xb4] ss:$8 sps:$4 sm:$0xff]   ;;  %v728_v31 = vld [vmem:[%s1085_s0 + $0x40] ss:$8 sps:$4 sm:$0xff]  }
   0xb   :  { %287 = vmatprep.subr.bf16.mxu0 %v840_v0  ;;  %674 = vmatprep.subr.bf16.mxu1 %v840_v0  ;;  %v39_v30 = vld [vmem:[%s1085_s0 + $0xc0] sm:$0xff]  ;;  %v733_v32 = vld [vmem:[%s1085_s0 + $0xb0] ss:$8 sps:$4 sm:$0xff]   ;;  %v731_v33 = vld [vmem:[%s1085_s0 + $0x54] ss:$8 sps:$4 sm:$0xff]  }
   0xc   :  { %v622_v34 = vcombine.high %v39_v30, %v39_v30  ;;  %v734_v35 = vld [vmem:[%s1085_s0 + $0x50] ss:$8 sps:$4 sm:$0xff]   ;;  %v621_v36 = vcombine.low %v39_v30, %v39_v30  ;;  %v736_v37 = vld [vmem:[%s1085_s0 + $0x64] ss:$8 sps:$4 sm:$0xff]   ;;  %v739_v38 = vld [vmem:[%s1085_s0 + $0x60] ss:$8 sps:$4 sm:$0xff]  }
   0xd   :  { %v982_v39 = vld [vmem:[%s1086_s2] ss:$0 sm:$0xff] }
   0xe   :  { %288 = vmatpush1.bf16.msra.mxu0 %v695_v4  ;;  %684 = vmatpush1.bf16.msra.mxu1 %v695_v4 }
   0xf   :  { %289 = vmatprep.subr.bf16.mxu0 %v840_v0  ;;  %675 = vmatprep.subr.bf16.mxu1 %v840_v0 }
  0x12   :  { %290 = vmatpush1.bf16.msra.mxu0 %v696_v7  ;;  %685 = vmatpush1.bf16.msra.mxu1 %v696_v7 }
  0x13   :  { %291 = vmatprep.subr.bf16.mxu0 %v840_v0  ;;  %676 = vmatprep.subr.bf16.mxu1 %v840_v0 }
  0x16   :  { %292 = vmatpush1.bf16.msra.mxu0 %v697_v8  ;;  %686 = vmatpush1.bf16.msra.mxu1 %v697_v8 }
  0x17   :  { %293 = vmatprep.subr.bf16.mxu0 %v840_v0  ;;  %677 = vmatprep.subr.bf16.mxu1 %v840_v0 }
  0x1a   :  { %294 = vmatpush1.bf16.msra.mxu0 %v698_v9  ;;  %687 = vmatpush1.bf16.msra.mxu1 %v698_v9 }
  0x1b   :  { %295 = vmatprep.subr.bf16.mxu0 %v840_v0  ;;  %678 = vmatprep.subr.bf16.mxu1 %v840_v0 }
  0x1e   :  { %296 = vmatpush1.bf16.msra.mxu0 %v699_v10  ;;  %688 = vmatpush1.bf16.msra.mxu1 %v699_v10 }
  0x1f   :  { %297 = vmatprep.subr.bf16.mxu0 %v840_v0  ;;  %679 = vmatprep.subr.bf16.mxu1 %v840_v0 }
  0x22   :  { %298 = vmatpush1.bf16.msra.mxu0 %v700_v11  ;;  %689 = vmatpush1.bf16.msra.mxu1 %v700_v11 }
  0x23   :  { %299 = vmatprep.subr.bf16.mxu0 %v840_v0  ;;  %680 = vmatprep.subr.bf16.mxu1 %v840_v0 }
  0x26   :  { %300 = vmatpush1.bf16.msra.mxu0 %v279_v13  ;;  %690 = vmatpush1.bf16.msra.mxu1 %v279_v13 }
  0x29   :  { %314 = vmatmul.mubr.bf16.vlgmr.msra.gmra.mrb[0].mxu0 %v702_v14  ;;  %370 = vmatmul.mubr.bf16.vlgmr.msra.gmra.mrb[0].mxu1 %v705_v15 }
  0x2a   :  { %634 = vmatprep.mubr.msk.bf16.mxu0 %vm237_vm0, %v708_v16  ;;  %641 = vmatprep.mubr.msk.bf16.mxu1 %vm237_vm0, %v711_v17 }
  0x31   :  { %322 = vmatmul.mubr.bf16.gmra.mrb[4].mxu0 %v710_v18  ;;  %378 = vmatmul.mubr.bf16.gmra.mrb[4].mxu1 %v715_v19 }
  0x32   :  { %635 = vmatprep.mubr.msk.bf16.mxu0 %vm237_vm0, %v713_v20  ;;  %642 = vmatprep.mubr.msk.bf16.mxu1 %vm237_vm0, %v717_v21 }
  0x39   :  { %330 = vmatmul.mubr.bf16.gmra.mrb[8].mxu0 %v716_v22  ;;  %386 = vmatmul.mubr.bf16.gmra.mrb[8].mxu1 %v721_v23 }
  0x3a   :  { %636 = vmatprep.mubr.msk.bf16.mxu0 %vm237_vm0, %v719_v24  ;;  %643 = vmatprep.mubr.msk.bf16.mxu1 %vm237_vm0, %v723_v25 }
  0x41   :  { %338 = vmatmul.mubr.bf16.gmra.mrb[12].mxu0 %v722_v26  ;;  %394 = vmatmul.mubr.bf16.gmra.mrb[12].mxu1 %v727_v27 }
  0x42   :  { %637 = vmatprep.mubr.msk.bf16.mxu0 %vm237_vm0, %v725_v28  ;;  %644 = vmatprep.mubr.msk.bf16.mxu1 %vm237_vm0, %v729_v29 }
  0x49   :  { %346 = vmatmul.mubr.bf16.gmra.mrb[16].mxu0 %v728_v31  ;;  %402 = vmatmul.mubr.bf16.gmra.mrb[16].mxu1 %v733_v32 }
  0x4a   :  { %638 = vmatprep.mubr.msk.bf16.mxu0 %vm237_vm0, %v731_v33  ;;  %645 = vmatprep.mubr.msk.bf16.mxu1 %vm237_vm0, %v622_v34 }
  0x51   :  { %354 = vmatmul.mubr.bf16.gmra.mrb[20].mxu0 %v734_v35  ;;  %410 = vmatmul.mubr.bf16.gmra.mrb[20].mxu1 %v621_v36 }
  0x52   :  { %639 = vmatprep.mubr.msk.bf16.mxu0 %vm237_vm0, %v736_v37 }
  0x59   :  { %362 = vmatmul.mubr.bf16.gmra.mrb[24].mxu0 %v739_v38 }
  0xfc   :  { %v315_v40 = vpop.f32.mrb[0].mxu0  ;;  %v371_v41 = vpop.f32.mrb[0].mxu1 }
  0xfd   :  { %v316_v42 = vadd.f32 %v982_v39, %v315_v40  ;;  %v317_v43 = vpop.f32.mrb[1].mxu0  ;;  %v372_v44 = vadd.f32 %v982_v39, %v371_v41  ;;  %v373_v45 = vpop.f32.mrb[1].mxu1 }
  0xfe   :  { %v318_v46 = vpop.f32.mrb[2].mxu0  ;;  %v374_v47 = vpop.f32.mrb[2].mxu1 }
  0xff   :  { %v646_v48 = vmul.f32 -1.442695, %v316_v42  ;;  %v319_v49 = vadd.f32 %v982_v39, %v318_v46  ;;  %v320_v50 = vpop.f32.mrb[3].mxu0  ;;  %v660_v51 = vmul.f32 -1.442695, %v372_v44  ;;  %v375_v52 = vadd.f32 %v982_v39, %v374_v47  ;;  %v376_v53 = vpop.f32.mrb[3].mxu1 }
 0x101   :  { %740 = vpow2.f32 %v646_v48  ;;  %v647_v54 = vmul.f32 -1.442695, %v319_v49  ;;  %v661_v55 = vmul.f32 -1.442695, %v375_v52 }
 0x102   :  { %742 = vpow2.f32 %v660_v51 }
 0x103   :  { %744 = vpow2.f32 %v647_v54 }
 0x104   :  { %v323_v56 = vpop.f32.mrb[4].mxu0  ;;  %746 = vpow2.f32 %v661_v55  ;;  %v379_v57 = vpop.f32.mrb[4].mxu1 }
 0x105   :  { %v324_v58 = vadd.f32 %v982_v39, %v323_v56  ;;  %v325_v59 = vpop.f32.mrb[5].mxu0  ;;  %v380_v60 = vadd.f32 %v982_v39, %v379_v57  ;;  %v381_v61 = vpop.f32.mrb[5].mxu1 }
 0x106   :  { %v326_v62 = vpop.f32.mrb[6].mxu0  ;;  %v382_v63 = vpop.f32.mrb[6].mxu1 }
 0x107   :  { %v648_v0 = vmul.f32 -1.442695, %v324_v58  ;;  %v327_v1 = vadd.f32 %v982_v39, %v326_v62  ;;  %v328_v2 = vpop.f32.mrb[7].mxu0  ;;  %v662_v3 = vmul.f32 -1.442695, %v380_v60  ;;  %v383_v4 = vadd.f32 %v982_v39, %v382_v63  ;;  %v384_v5 = vpop.f32.mrb[7].mxu1 }
 0x109   :  { %748 = vpow2.f32 %v648_v0  ;;  %v649_v6 = vmul.f32 -1.442695, %v327_v1  ;;  %v663_v7 = vmul.f32 -1.442695, %v383_v4 }
 0x10a   :  { %750 = vpow2.f32 %v662_v3 }
 0x10b   :  { %v741_v8 = vpop.eup %740  ;;  %752 = vpow2.f32 %v649_v6 }
 0x10c   :  { %v743_v9 = vpop.eup %742  ;;  %v492_v10 = vadd.f32 1.0, %v741_v8  ;;  %v331_v11 = vpop.f32.mrb[8].mxu0  ;;  %754 = vpow2.f32 %v663_v7 }
 0x10d   :  { %v387_v12 = vpop.f32.mrb[8].mxu1  ;;  %v745_v13 = vpop.eup %744  ;;  %v506_v14 = vadd.f32 1.0, %v743_v9  ;;  %v332_v15 = vadd.f32 %v982_v39, %v331_v11 }
 0x10e   :  { %v333_v16 = vpop.f32.mrb[9].mxu0  ;;  %v388_v17 = vadd.f32 %v982_v39, %v387_v12  ;;  %v389_v18 = vpop.f32.mrb[9].mxu1  ;;  %756 = vrcp.f32 %v492_v10  ;;  %v493_v20 = vadd.f32 1.0, %v745_v13 }
 0x10f   :  { %v747_v19 = vpop.eup %746  ;;  %v334_v21 = vpop.f32.mrb[10].mxu0  ;;  %758 = vrcp.f32 %v506_v14  ;;  %v650_v24 = vmul.f32 -1.442695, %v332_v15 }
 0x110   :  { %v390_v22 = vpop.f32.mrb[10].mxu1  ;;  %v507_v23 = vadd.f32 1.0, %v747_v19  ;;  %v335_v25 = vadd.f32 %v982_v39, %v334_v21  ;;  %v336_v26 = vpop.f32.mrb[11].mxu0  ;;  %760 = vrcp.f32 %v493_v20  ;;  %v664_v28 = vmul.f32 -1.442695, %v388_v17 }
 0x111   :  { %v392_v27 = vpop.f32.mrb[11].mxu1  ;;  %v391_v29 = vadd.f32 %v982_v39, %v390_v22 }
 0x112   :  { %762 = vrcp.f32 %v507_v23  ;;  %v651_v30 = vmul.f32 -1.442695, %v335_v25 }
 0x113   :  { %764 = vpow2.f32 %v650_v24  ;;  %v665_v31 = vmul.f32 -1.442695, %v391_v29  ;;  %v749_v32 = vpop.eup %748 }
 0x114   :  { %766 = vpow2.f32 %v651_v30  ;;  %v751_v33 = vpop.eup %750  ;;  %v494_v34 = vadd.f32 1.0, %v749_v32  ;;  %v339_v35 = vpop.f32.mrb[12].mxu0 }
 0x115   :  { %768 = vpow2.f32 %v664_v28  ;;  %v395_v36 = vpop.f32.mrb[12].mxu1  ;;  %v753_v37 = vpop.eup %752  ;;  %v508_v38 = vadd.f32 1.0, %v751_v33  ;;  %v340_v40 = vadd.f32 %v982_v39, %v339_v35 }
 0x116   :  { %v341_v41 = vpop.f32.mrb[13].mxu0  ;;  %770 = vpow2.f32 %v665_v31  ;;  %v396_v42 = vadd.f32 %v982_v39, %v395_v36  ;;  %v397_v43 = vpop.f32.mrb[13].mxu1  ;;  %v495_v45 = vadd.f32 1.0, %v753_v37 }
 0x117   :  { %v755_v44 = vpop.eup %754  ;;  %772 = vrcp.f32 %v494_v34  ;;  %v342_v46 = vpop.f32.mrb[14].mxu0  ;;  %v652_v49 = vmul.f32 -1.442695, %v340_v40 }
 0x118   :  { %v398_v47 = vpop.f32.mrb[14].mxu1  ;;  %774 = vrcp.f32 %v508_v38  ;;  %v509_v48 = vadd.f32 1.0, %v755_v44  ;;  %v343_v50 = vadd.f32 %v982_v39, %v342_v46  ;;  %v344_v51 = vpop.f32.mrb[15].mxu0  ;;  %v666_v54 = vmul.f32 -1.442695, %v396_v42 }
 0x119   :  { %v400_v52 = vpop.f32.mrb[15].mxu1  ;;  %v757_v53 = vpop.eup %756  ;;  %776 = vrcp.f32 %v495_v45  ;;  %v399_v55 = vadd.f32 %v982_v39, %v398_v47 }
 0x11a   :  { %v759_v56 = vpop.eup %758  ;;  %567 = vst [vmem:[%s1087_s3] sm:$0xff] %v757_v53  ;;  %778 = vrcp.f32 %v509_v48  ;;  %v653_v57 = vmul.f32 -1.442695, %v343_v50 }
 0x11b   :  { %v761_v58 = vpop.eup %760  ;;  %581 = vst [vmem:[%s1087_s3 + $0x70] sm:$0xff] %v759_v56  ;;  %780 = vpow2.f32 %v652_v49  ;;  %v667_v59 = vmul.f32 -1.442695, %v399_v55 }
 0x11c   :  { %v763_v60 = vpop.eup %762  ;;  %568 = vst [vmem:[%s1087_s3 + $0x8] sm:$0xff] %v761_v58  ;;  %782 = vpow2.f32 %v653_v57  ;;  %v347_v62 = vpop.f32.mrb[16].mxu0 }
 0x11d   :  { %v765_v61 = vpop.eup %764  ;;  %582 = vst [vmem:[%s1087_s3 + $0x78] sm:$0xff] %v763_v60  ;;  %784 = vpow2.f32 %v666_v54  ;;  %v403_v63 = vpop.f32.mrb[16].mxu1  ;;  %v348_v2 = vadd.f32 %v982_v39, %v347_v62 }
 0x11e   :  { %v767_v0 = vpop.eup %766  ;;  %v496_v1 = vadd.f32 1.0, %v765_v61  ;;  %v349_v3 = vpop.f32.mrb[17].mxu0  ;;  %786 = vpow2.f32 %v667_v59  ;;  %v404_v4 = vadd.f32 %v982_v39, %v403_v63 }
 0x11f   :  { %v405_v5 = vpop.f32.mrb[17].mxu1  ;;  %v769_v6 = vpop.eup %768  ;;  %v497_v7 = vadd.f32 1.0, %v767_v0  ;;  %v654_v12 = vmul.f32 -1.442695, %v348_v2 }
 0x120   :  { %v350_v8 = vpop.f32.mrb[18].mxu0  ;;  %v406_v9 = vpop.f32.mrb[18].mxu1  ;;  %788 = vrcp.f32 %v496_v1  ;;  %v510_v11 = vadd.f32 1.0, %v769_v6  ;;  %v668_v21 = vmul.f32 -1.442695, %v404_v4 }
 0x121   :  { %v771_v10 = vpop.eup %770  ;;  %v351_v13 = vadd.f32 %v982_v39, %v350_v8  ;;  %v352_v14 = vpop.f32.mrb[19].mxu0  ;;  %790 = vrcp.f32 %v497_v7  ;;  %v407_v18 = vadd.f32 %v982_v39, %v406_v9 }
 0x122   :  { %v408_v15 = vpop.f32.mrb[19].mxu1  ;;  %v773_v16 = vpop.eup %772  ;;  %v511_v17 = vadd.f32 1.0, %v771_v10  ;;  %792 = vrcp.f32 %v510_v11 }
 0x123   :  { %v775_v19 = vpop.eup %774  ;;  %569 = vst [vmem:[%s1087_s3 + $0x10] sm:$0xff] %v773_v16  ;;  %v655_v20 = vmul.f32 -1.442695, %v351_v13  ;;  %v669_v23 = vmul.f32 -1.442695, %v407_v18 }
 0x124   :  { %v777_v22 = vpop.eup %776  ;;  %583 = vst [vmem:[%s1087_s3 + $0x80] sm:$0xff] %v775_v19  ;;  %794 = vrcp.f32 %v511_v17  ;;  %v355_v26 = vpop.f32.mrb[20].mxu0 }
 0x125   :  { %v779_v24 = vpop.eup %778  ;;  %570 = vst [vmem:[%s1087_s3 + $0x18] sm:$0xff] %v777_v22  ;;  %796 = vpow2.f32 %v654_v12  ;;  %v411_v27 = vpop.f32.mrb[20].mxu1  ;;  %v356_v30 = vadd.f32 %v982_v39, %v355_v26 }
 0x126   :  { %v781_v25 = vpop.eup %780  ;;  %584 = vst [vmem:[%s1087_s3 + $0x88] sm:$0xff] %v779_v24  ;;  %798 = vpow2.f32 %v655_v20  ;;  %v357_v31 = vpop.f32.mrb[21].mxu0  ;;  %v412_v32 = vadd.f32 %v982_v39, %v411_v27 }
 0x127   :  { %v783_v28 = vpop.eup %782  ;;  %v498_v29 = vadd.f32 1.0, %v781_v25  ;;  %800 = vpow2.f32 %v668_v21  ;;  %v413_v33 = vpop.f32.mrb[21].mxu1  ;;  %v656_v41 = vmul.f32 -1.442695, %v356_v30 }
 0x128   :  { %v785_v34 = vpop.eup %784  ;;  %v499_v35 = vadd.f32 1.0, %v783_v28  ;;  %802 = vpow2.f32 %v669_v23  ;;  %v358_v36 = vpop.f32.mrb[22].mxu0  ;;  %v670_v48 = vmul.f32 -1.442695, %v412_v32 }
 0x129   :  { %v414_v37 = vpop.f32.mrb[22].mxu1  ;;  %v787_v38 = vpop.eup %786  ;;  %804 = vrcp.f32 %v498_v29  ;;  %v512_v40 = vadd.f32 1.0, %v785_v34  ;;  %v359_v42 = vadd.f32 %v982_v39, %v358_v36 }
 0x12a   :  { %v360_v43 = vpop.f32.mrb[23].mxu0  ;;  %v415_v44 = vpop.f32.mrb[23].mxu1  ;;  %806 = vrcp.f32 %v499_v35  ;;  %v513_v45 = vadd.f32 1.0, %v787_v38 }
 0x12b   :  { %v789_v46 = vpop.eup %788  ;;  %808 = vrcp.f32 %v512_v40  ;;  %v657_v47 = vmul.f32 -1.442695, %v359_v42 }
 0x12c   :  { %v791_v49 = vpop.eup %790  ;;  %571 = vst [vmem:[%s1087_s3 + $0x20] sm:$0xff] %v789_v46  ;;  %810 = vrcp.f32 %v513_v45  ;;  %v363_v52 = vpop.f32.mrb[24].mxu0 }
 0x12d   :  { %v793_v50 = vpop.eup %792  ;;  %572 = vst [vmem:[%s1087_s3 + $0x28] sm:$0xff] %v791_v49  ;;  %812 = vpow2.f32 %v656_v41  ;;  %v364_v54 = vadd.f32 %v982_v39, %v363_v52  ;;  %v365_v55 = vpop.f32.mrb[25].mxu0 }
 0x12e   :  { %v795_v51 = vpop.eup %794  ;;  %585 = vst [vmem:[%s1087_s3 + $0x90] sm:$0xff] %v793_v50  ;;  %814 = vpow2.f32 %v657_v47  ;;  %v366_v58 = vpop.f32.mrb[26].mxu0 }
 0x12f   :  { %v797_v53 = vpop.eup %796  ;;  %586 = vst [vmem:[%s1087_s3 + $0x98] sm:$0xff] %v795_v51  ;;  %816 = vpow2.f32 %v670_v48  ;;  %v367_v61 = vadd.f32 %v982_v39, %v366_v58  ;;  %v368_v62 = vpop.f32.mrb[27].mxu0  ;;  %v658_v1 = vmul.f32 -1.442695, %v364_v54 }
 0x130   :  { %v799_v56 = vpop.eup %798  ;;  %v500_v57 = vadd.f32 1.0, %v797_v53 }
 0x131   :  { %v801_v59 = vpop.eup %800  ;;  %v501_v60 = vadd.f32 1.0, %v799_v56  ;;  %v659_v4 = vmul.f32 -1.442695, %v367_v61 }
 0x132   :  { %v803_v63 = vpop.eup %802  ;;  %818 = vrcp.f32 %v500_v57  ;;  %v514_v0 = vadd.f32 1.0, %v801_v59 }
 0x133   :  { %v805_v2 = vpop.eup %804  ;;  %820 = vrcp.f32 %v501_v60  ;;  %v515_v3 = vadd.f32 1.0, %v803_v63 }
 0x134   :  { %v807_v5 = vpop.eup %806  ;;  %573 = vst [vmem:[%s1087_s3 + $0x30] sm:$0xff] %v805_v2  ;;  %822 = vrcp.f32 %v514_v0 }
 0x135   :  { %v809_v6 = vpop.eup %808  ;;  %574 = vst [vmem:[%s1087_s3 + $0x38] sm:$0xff] %v807_v5  ;;  %824 = vrcp.f32 %v515_v3 }
 0x136   :  { %v811_v39 = vpop.eup %810  ;;  %587 = vst [vmem:[%s1087_s3 + $0xa0] sm:$0xff] %v809_v6  ;;  %826 = vpow2.f32 %v658_v1 }
 0x137   :  { %v813_v7 = vpop.eup %812  ;;  %588 = vst [vmem:[%s1087_s3 + $0xa8] sm:$0xff] %v811_v39  ;;  %828 = vpow2.f32 %v659_v4 }
 0x138   :  { %v815_v8 = vpop.eup %814  ;;  %v502_v9 = vadd.f32 1.0, %v813_v7 }
 0x139   :  { %v817_v10 = vpop.eup %816  ;;  %v503_v11 = vadd.f32 1.0, %v815_v8 }
 0x13a   :  { %830 = vrcp.f32 %v502_v9  ;;  %v516_v12 = vadd.f32 1.0, %v817_v10 }
 0x13b   :  { %832 = vrcp.f32 %v503_v11 }
 0x13c   :  { %v819_v13 = vpop.eup %818  ;;  %834 = vrcp.f32 %v516_v12 }
 0x13d   :  { %v821_v14 = vpop.eup %820  ;;  %575 = vst [vmem:[%s1087_s3 + $0x40] sm:$0xff] %v819_v13 }
 0x13e   :  { %v823_v15 = vpop.eup %822  ;;  %576 = vst [vmem:[%s1087_s3 + $0x48] sm:$0xff] %v821_v14 }
 0x13f   :  { %v825_v16 = vpop.eup %824  ;;  %589 = vst [vmem:[%s1087_s3 + $0xb0] sm:$0xff] %v823_v15 }
 0x140   :  { %v827_v17 = vpop.eup %826  ;;  %590 = vst [vmem:[%s1087_s3 + $0xb8] sm:$0xff] %v825_v16 }
 0x141   :  { %v829_v18 = vpop.eup %828  ;;  %v504_v19 = vadd.f32 1.0, %v827_v17 }
 0x142   :  { %v505_v20 = vadd.f32 1.0, %v829_v18 }
 0x143   :  { %836 = vrcp.f32 %v504_v19 }
 0x144   :  { %v831_v21 = vpop.eup %830  ;;  %838 = vrcp.f32 %v505_v20 }
 0x145   :  { %v833_v22 = vpop.eup %832  ;;  %577 = vst [vmem:[%s1087_s3 + $0x50] sm:$0xff] %v831_v21 }
 0x146   :  { %v835_v23 = vpop.eup %834  ;;  %578 = vst [vmem:[%s1087_s3 + $0x58] sm:$0xff] %v833_v22 }
 0x147   :  { %591 = vst [vmem:[%s1087_s3 + $0xc0] sm:$0xff] %v835_v23 }
 0x14d   :  { %v837_v24 = vpop.eup %836 }
 0x14e   :  { %v839_v25 = vpop.eup %838  ;;  %579 = vst [vmem:[%s1087_s3 + $0x60] sm:$0xff] %v837_v24 }
 0x14f   :  { %580 = vst [vmem:[%s1087_s3 + $0x68] sm:$0xff] %v839_v25 }

// kernel: lenet_forward.8
= control target key start
LH: loop header
LB: loop body
LE: loop exit
PB: predicated region body
PF: predicated region fallthrough
CT: control target
= control target key end

     0   :  { %s359_s6 = smov 0   ;;  %s361_s7 = smov 0   ;;  %s410_s0 = inlined_call_operand.vmem [shape: f32[2,10,5,256], index: 0, kind: input, shape index: {}]   ;;  %s411_s1 = inlined_call_operand.vmem [shape: f32[2,5,5,128], index: 1, kind: output, shape index: {}]  }
   0x1   :  { %s363_s8 = smov 0   ;;  %s365_s9 = smov 0  }
   0x2   :  { %s367_s10 = smov 0  }
   0x3 LB: > { %s20_s11 = sadd.s32 1, %s339_s8  ;;  %s23_s12 = sadd.s32 1, %s343_s9  ;;  %s347_s10 = sphi %s367_s10, %s11_s10   ;;  %s343_s9 = sphi %s365_s9, %s415_s9   ;;  %s339_s8 = sphi %s363_s8, %s414_s8   ;;  %s335_s7 = sphi %s361_s7, %s413_s7   ;;  %s331_s6 = sphi %s359_s6, %s412_s6  }
   0x4   : > { %p21_p0 = scmp.ge.s32.totalorder %s20_s11, 5  ;;  %p258_p1 = scmp.ge.s32.totalorder %s347_s10, 1 }
   0x5   : > { %p109_p2 = scmp.lt.s32.totalorder %s347_s10, 11 }
   0x6   : > { %s417_s11 = smov (%p21_p0, %s20_s11), 0  ;;  %s419_s12 = smov (!%p21_p0, %s23_s12), %s343_s9 }
   0x7   : > { %p110_p3 = pnand %p258_p1, %p109_p2  ;;  %p25_p4 = scmp.ge.s32.totalorder %s419_s12, 2 }
   0x8   : > { %s259_s13 = sshll.u32 (!%p110_p3), %s331_s6, 1  ;;  %p138_p5 = scmp.lt.s32.totalorder (!%p110_p3), %s335_s7, 1 }
   0x9   : > { %s421_s12 = smov (%p25_p4, %s419_s12), 0  ;;  %113 = sbr.rel (%p110_p3) target bundleno = 29 (0x1d), region = 24 }
   0xa   : > { %p140_p6 = scmp.lt.s32.totalorder (!%p110_p3), %s259_s13, 9  ;;  %p150_p7 = scmp.lt.s32.totalorder (!%p110_p3), %s331_s6, 4 }
  0x10   : > { %s423_s7 = smov (!%p138_p5, %s335_s7), 1  ;;  %s425_s13 = smov (!%p140_p6, %s259_s13), 9 }
  0x11   : > { %s267_s14 = smul.u32 20, %s423_s7  ;;  %s260_s15 = sshll.u32 %s425_s13, 1 }
  0x12   : > { %s268_s18 = smul.u32 5, %s423_s7  ;;  %s427_s6 = smov (!%p150_p7, %s331_s6), 4 }
  0x13   : > { %s144_s16 = sadd.s32 %s267_s14, %s260_s15 }
  0x14   : > { %s261_s17 = sshll.u32 %s144_s16, 3  ;;  %s153_s22 = sadd.s32 %s268_s18, %s427_s6 }
  0x15   : > { %s146_s21 = scalar_lea.vmem %s410_s0, %s261_s17  ;;  %s262_s23 = sshll.u32 %s153_s22, 3 }
  0x16   : > { %v156_v0 = vld [vmem:[%s146_s21] sm:$0x1f]  ;;  %v157_v1 = vld [vmem:[%s146_s21 + $0x8] sm:$0x1f]  ;;  %v263_v2 = vld [vmem:[%s146_s21 + $0x10] sm:$0x1f]  ;;  %s155_s26 = scalar_lea.vmem %s411_s1, %s262_s23 }
  0x17   : > { %v264_v3 = vld [vmem:[%s146_s21 + $0x18] sm:$0x1f]  ;;  %v161_v4 = vmax.f32 %v156_v0, %v263_v2 }
  0x18   : > { %v162_v5 = vmax.f32 %v157_v1, %v264_v3 }
  0x1a   : > { %v163_v6 = vmax.f32 %v161_v4, %v162_v5 }
  0x1c   : > { %164 = vst [vmem:[%s155_s26] sm:$0x1f] %v163_v6 }
  0x1d PF: > { %s11_s10 = sadd.s32 1, %s347_s10   ;;  %s412_s6 = smov %s339_s8 }
  0x1e   : > { %p8_p8 = scmp.ge.s32.totalorder %s11_s10, 12   ;;  %s413_s7 = smov %s343_s9 }
  0x1f   : > { %s414_s8 = smov %s417_s11  ;;  %s415_s9 = smov %s421_s12 }
  0x20   :  { %10 = sbr.rel (!%p8_p8) target bundleno = 3 (0x3), region = 55 }

// kernel: lenet_forward.9
= control target key start
LH: loop header
LB: loop body
LE: loop exit
PB: predicated region body
PF: predicated region fallthrough
CT: control target
= control target key end

     0   :  { %v805_v1 = vmov 0   ;;  %v98_v21 = vlaneseq  ;;  %v806_v26 = vmov 1966171168   ;;  %vm264_vm0 = vcmask 130048   ;;  %s1025_s0 = inlined_call_operand.vmem [shape: bf16[2,400], index: 0, kind: input, shape index: {}]   ;;  %s1026_s1 = inlined_call_operand.vmem [shape: bf16[400,128], index: 1, kind: input, shape index: {}]   ;;  %s1027_s2 = inlined_call_operand.vmem [shape: f32[1,128], index: 2, kind: input, shape index: {}]   ;;  %s1028_s3 = inlined_call_operand.vmem [shape: bf16[128,128], index: 3, kind: input, shape index: {}]   ;;  %s1029_s4 = inlined_call_operand.vmem [shape: f32[1,128], index: 4, kind: input, shape index: {}]   ;;  %s1030_s5 = inlined_call_operand.vmem [shape: bf16[128,128], index: 5, kind: input, shape index: {}]   ;;  %s1031_s6 = inlined_call_operand.vmem [shape: f32[1,128], index: 6, kind: input, shape index: {}]   ;;  %s1032_s7 = inlined_call_operand.hbm [shape: f32[2,128], index: 7, kind: output, shape index: {}]  }
   0x1   :  { %v732_v0 = vld [vmem:[%s1026_s1 + $0x40] sm:$0xff]   ;;  %308 = vmatprep.subr.bf16.mxu1 %v805_v1  ;;  %v735_v4 = vld [vmem:[%s1026_s1 + $0x48] sm:$0xff]   ;;  %v738_v7 = vld [vmem:[%s1026_s1 + $0x50] sm:$0xff]   ;;  %v96_v27 = vunpack.c.l.s4 %v806_v26 }
   0x2   :  { %v733_v2 = vld [vmem:[%s1026_s1 + $0x80] sm:$0xff]   ;;  %647 = vmatprep.subr.bf16.mxu0 %v732_v0  ;;  %v736_v5 = vld [vmem:[%s1026_s1 + $0x88] sm:$0xff]   ;;  %v739_v8 = vld [vmem:[%s1026_s1 + $0x90] sm:$0xff]   ;;  %v99_v28 = vshrl.u32 %v98_v21, 7 }
   0x3   :  { %v734_v3 = vld [vmem:[%s1026_s1] sm:$0xff]   ;;  %309 = vmatpush1.bf16.msra.mxu1 %v733_v2  ;;  %v737_v6 = vld [vmem:[%s1026_s1 + $0x8] sm:$0xff]   ;;  %v740_v9 = vld [vmem:[%s1026_s1 + $0x10] sm:$0xff]   ;;  %v97_v31 = vunpack.c.0.s8 %v96_v27 }
   0x4   :  { %648 = vmatpush3.bf16.msra.mxu0 %v734_v3  ;;  %310 = vmatprep.subr.bf16.mxu1 %v805_v1  ;;  %v741_v10 = vld [vmem:[%s1026_s1 + $0x58] sm:$0xff]   ;;  %v744_v13 = vld [vmem:[%s1026_s1 + $0x60] sm:$0xff]   ;;  %v747_v16 = vld [vmem:[%s1026_s1 + $0x68] sm:$0xff]  }
   0x5   :  { %649 = vmatprep.subr.bf16.mxu0 %v735_v4  ;;  %v742_v11 = vld [vmem:[%s1026_s1 + $0x98] sm:$0xff]   ;;  %v745_v14 = vld [vmem:[%s1026_s1 + $0xa0] sm:$0xff]   ;;  %v748_v17 = vld [vmem:[%s1026_s1 + $0xa8] sm:$0xff]   ;;  %v100_v32 = vsub.s32 %v97_v31, %v99_v28 }
   0x6   :  { %v743_v12 = vld [vmem:[%s1026_s1 + $0x18] sm:$0xff]   ;;  %v746_v15 = vld [vmem:[%s1026_s1 + $0x20] sm:$0xff]   ;;  %v749_v18 = vld [vmem:[%s1026_s1 + $0x28] sm:$0xff]  }
   0x7   :  { %311 = vmatpush1.bf16.msra.mxu1 %v736_v5  ;;  %v750_v19 = vld [vmem:[%s1026_s1 + $0x70] sm:$0xff]   ;;  %v753_v23 = vld [vmem:[%s1026_s1 + $0x78] sm:$0xff]   ;;  %v600_v24 = vld.sshfl [vmem:[%s1025_s0] sm:$0x33 pattern:$0x75316420] }
   0x8   :  { %650 = vmatpush3.bf16.msra.mxu0 %v737_v6  ;;  %312 = vmatprep.subr.bf16.mxu1 %v805_v1  ;;  %v751_v20 = vld [vmem:[%s1026_s1 + $0xb0] sm:$0xff]   ;;  %v754_v25 = vld [vmem:[%s1026_s1 + $0xb8] sm:$0xff]   ;;  %v94_v30 = vcombine.high %v600_v24, %v600_v24  ;;  %v756_v33 = vld [vmem:[%s1026_s1 + $0xc0] sm:$0xff]   ;;  %v101_v35 = vrot.slane %v600_v24, %v100_v32 }
   0x9   :  { %651 = vmatprep.subr.bf16.mxu0 %v738_v7  ;;  %v752_v22 = vld [vmem:[%s1026_s1 + $0x30] sm:$0xff]   ;;  %v755_v29 = vld [vmem:[%s1026_s1 + $0x38] sm:$0xff]  }
   0xa   :  { %v108_v34 = vrot.slane %v94_v30, %v100_v32  ;;  %v109_v37 = vcombine.high %v101_v35, %v101_v35 }
   0xb   :  { %313 = vmatpush1.bf16.msra.mxu1 %v739_v8 }
   0xc   :  { %652 = vmatpush3.bf16.msra.mxu0 %v740_v9  ;;  %314 = vmatprep.subr.bf16.mxu1 %v805_v1  ;;  %v110_v36 = vcombine.high %v108_v34, %v108_v34 }
   0xd   :  { %653 = vmatprep.subr.bf16.mxu0 %v741_v10  ;;  %300 = vmatprep.mubr.bf16.mxu0 %v108_v34 }
   0xe   :  { %626 = vmatprep.mubr.msk.bf16.mxu1 %vm264_vm0, %v110_v36 }
   0xf   :  { %315 = vmatpush1.bf16.msra.mxu1 %v742_v11 }
  0x10   :  { %654 = vmatpush3.bf16.msra.mxu0 %v743_v12  ;;  %316 = vmatprep.subr.bf16.mxu1 %v805_v1 }
  0x11   :  { %655 = vmatprep.subr.bf16.mxu0 %v744_v13 }
  0x13   :  { %317 = vmatpush1.bf16.msra.mxu1 %v745_v14 }
  0x14   :  { %656 = vmatpush3.bf16.msra.mxu0 %v746_v15  ;;  %318 = vmatprep.subr.bf16.mxu1 %v805_v1 }
  0x15   :  { %657 = vmatprep.subr.bf16.mxu0 %v747_v16 }
  0x17   :  { %319 = vmatpush1.bf16.msra.mxu1 %v748_v17 }
  0x18   :  { %658 = vmatpush3.bf16.msra.mxu0 %v749_v18  ;;  %320 = vmatprep.subr.bf16.mxu1 %v805_v1 }
  0x19   :  { %659 = vmatprep.subr.bf16.mxu0 %v750_v19 }
  0x1b   :  { %321 = vmatpush1.bf16.msra.mxu1 %v751_v20 }
  0x1c   :  { %660 = vmatpush3.bf16.msra.mxu0 %v752_v22  ;;  %322 = vmatprep.subr.bf16.mxu1 %v805_v1 }
  0x1d   :  { %661 = vmatprep.subr.bf16.mxu0 %v753_v23 }
  0x1f   :  { %323 = vmatpush1.bf16.msra.mxu1 %v754_v25 }
  0x20   :  { %662 = vmatpush3.bf16.msra.mxu0 %v755_v29  ;;  %324 = vmatprep.subr.bf16.mxu1 %v805_v1 }
  0x23   :  { %301 = vmatmul.mubr.bf16.vlgmr.msra.gmra.mrb[0].mxu0 %v101_v35  ;;  %325 = vmatpush1.bf16.msra.mxu1 %v756_v33 }
  0x24   :  { %12 = vsyncpa [#allocation3], 0  ;;  %v757_v38 = vld [vmem:[%s1028_s3] sm:$0xff]   ;;  %v807_v39 = vmov 0.0   ;;  %v758_v40 = vld [vmem:[%s1028_s3 + $0x8] sm:$0xff]   ;;  %vm808_vm1 = vmmov 0  }
  0x25   :  { %687 = vmatprep.subr.bf16.mxu0 %v807_v39  ;;  %707 = vmatprep.subr.bf16.mxu1 %v807_v39  ;;  %v759_v41 = vld [vmem:[%s1028_s3 + $0x10] sm:$0xff]   ;;  %v760_v42 = vld [vmem:[%s1028_s3 + $0x18] sm:$0xff]   ;;  %v761_v43 = vld [vmem:[%s1028_s3 + $0x20] sm:$0xff]   ;;  %s809_s15 = smov [#allocation2]  }
  0x26   :  { %341 = vmatmul.mubr.bf16.vlgmr.msra.gmra.mrb[0].mxu1 %v109_v37  ;;  %688 = vmatpush3.bf16.msra.mxu0 %v757_v38  ;;  %v762_v44 = vld [vmem:[%s1028_s3 + $0x28] sm:$0xff]   ;;  %v763_v45 = vld [vmem:[%s1028_s3 + $0x30] sm:$0xff]   ;;  %v764_v46 = vld [vmem:[%s1028_s3 + $0x38] sm:$0xff]   ;;  %s591_s16 = sshll.u32 %s809_s15, 4  ;;  %s592_s16 = int_to_ptr.vmem [resolvable:$true] %s591_s16 }
  0x27   :  { %689 = vmatprep.subr.bf16.mxu0 %v807_v39  ;;  %703 = vmatprep.mubr.msk.bf16.mxu0 %vm808_vm1, %v807_v39  ;;  %v599_v49 = vld [vmem:[%s1027_s2] ss:$0 sm:$0xff]  ;;  %v766_v1 = vld [vmem:[%s1030_s5 + $0x8] sm:$0xff]   ;;  %v767_v2 = vld [vmem:[%s1030_s5 + $0x10] sm:$0xff]   ;;  %p786_p1 = scmp.lt.s32.totalorder %s592_s16, %s592_s16 }
  0x28   :  { %723 = vmatprep.mubr.msk.bf16.mxu1 %vm808_vm1, %v807_v39  ;;  %v765_v0 = vld [vmem:[%s1030_s5] sm:$0xff]   ;;  %v768_v3 = vld [vmem:[%s1030_s5 + $0x18] sm:$0xff]   ;;  %v770_v5 = vld [vmem:[%s1030_s5 + $0x28] sm:$0xff]  }
  0x29   :  { %708 = vmatpush3.bf16.msra.mxu1 %v765_v0  ;;  %v769_v4 = vld [vmem:[%s1030_s5 + $0x20] sm:$0xff]   ;;  %v771_v6 = vld [vmem:[%s1030_s5 + $0x30] sm:$0xff]   ;;  %v772_v7 = vld [vmem:[%s1030_s5 + $0x38] sm:$0xff]  }
  0x2a   :  { %690 = vmatpush3.bf16.msra.mxu0 %v758_v40  ;;  %709 = vmatprep.subr.bf16.mxu1 %v807_v39  ;;  %v628_v8 = vld [vmem:[%s1029_s4] ss:$0 sm:$0xff]  ;;  %s781_s4 = scalar_lea.vmem %s592_s16, 32 }
  0x2b   :  { %691 = vmatprep.subr.bf16.mxu0 %v807_v39  ;;  %v638_v19 = vld [vmem:[%s1031_s6] ss:$0 sm:$0xff]  ;;  %p782_p0 = scmp.ne.s32.totalorder %s592_s16, %s781_s4  ;;  %p787_p2 = scmp.lt.s32.totalorder %s781_s4, %s781_s4 }
  0x2d   :  { %710 = vmatpush3.bf16.msra.mxu1 %v766_v1  ;;  %p788_p3 = por %p787_p2, %p786_p1 }
  0x2e   :  { %692 = vmatpush3.bf16.msra.mxu0 %v759_v41  ;;  %711 = vmatprep.subr.bf16.mxu1 %v807_v39 }
  0x2f   :  { %693 = vmatprep.subr.bf16.mxu0 %v807_v39  ;;  %p789_p4 = pnand %p788_p3, %p782_p0 }
  0x31   :  { %712 = vmatpush3.bf16.msra.mxu1 %v767_v2 }
  0x32   :  { %694 = vmatpush3.bf16.msra.mxu0 %v760_v42  ;;  %713 = vmatprep.subr.bf16.mxu1 %v807_v39 }
  0x33   :  { %695 = vmatprep.subr.bf16.mxu0 %v807_v39 }
  0x35   :  { %714 = vmatpush3.bf16.msra.mxu1 %v768_v3 }
  0x36   :  { %696 = vmatpush3.bf16.msra.mxu0 %v761_v43  ;;  %715 = vmatprep.subr.bf16.mxu1 %v807_v39 }
  0x37   :  { %697 = vmatprep.subr.bf16.mxu0 %v807_v39 }
  0x39   :  { %716 = vmatpush3.bf16.msra.mxu1 %v769_v4 }
  0x3a   :  { %698 = vmatpush3.bf16.msra.mxu0 %v762_v44  ;;  %717 = vmatprep.subr.bf16.mxu1 %v807_v39 }
  0x3b   :  { %699 = vmatprep.subr.bf16.mxu0 %v807_v39 }
  0x3d   :  { %718 = vmatpush3.bf16.msra.mxu1 %v770_v5 }
  0x3e   :  { %700 = vmatpush3.bf16.msra.mxu0 %v763_v45  ;;  %719 = vmatprep.subr.bf16.mxu1 %v807_v39 }
  0x3f   :  { %701 = vmatprep.subr.bf16.mxu0 %v807_v39 }
  0x41   :  { %720 = vmatpush3.bf16.msra.mxu1 %v771_v6 }
  0x42   :  { %702 = vmatpush3.bf16.msra.mxu0 %v764_v46  ;;  %721 = vmatprep.subr.bf16.mxu1 %v807_v39 }
  0x45   :  { %722 = vmatpush3.bf16.msra.mxu1 %v772_v7 }
  0xf6   :  { %v663_v47 = vpop.f32.mrb[0].mxu0 }
  0xf7   :  { %v664_v48 = vpop.f32.mrb[1].mxu0 }
  0xf8   :  { %v665_v50 = vadd.f32 %v664_v48, %v663_v47  ;;  %v666_v51 = vpop.f32.mrb[2].mxu0 }
  0xf9   :  { %v667_v52 = vpop.f32.mrb[3].mxu0  ;;  %v342_v53 = vpop.f32.mrb[0].mxu1 }
  0xfa   :  { %v303_v54 = vadd.f32 %v665_v50, %v599_v49  ;;  %v344_v55 = vpop.f32.mrb[1].mxu1 }
  0xfb   :  { %v345_v56 = vpop.f32.mrb[2].mxu1 }
  0xfc   :  { %v343_v57 = vadd.f32 %v342_v53, %v303_v54  ;;  %v346_v58 = vpop.f32.mrb[3].mxu1 }
  0xfe   :  { %v627_v59 = vmul.f32 -1.442695, %v343_v57 }
 0x100   :  { %773 = vpow2.f32 %v627_v59 }
 0x10a   :  { %v774_v60 = vpop.eup %773 }
 0x10b   :  { %v351_v61 = vadd.f32 1.0, %v774_v60 }
 0x10d   :  { %775 = vrcp.f32 %v351_v61 }
 0x117   :  { %v776_v62 = vpop.eup %775 }
 0x118   :  { %v354_v63 = vpack.c.bf16 %v776_v62, %v776_v62 }
 0x11a   :  { %704 = vmatmul.mubr.bf16.vlgmr.msra.gmra.mrb[4].mxu0 %v354_v63 }
 0x1ed   :  { %v460_v9 = vpop.f32.mrb[4].mxu0 }
 0x1ee   :  { %v461_v10 = vadd.f32 %v628_v8, %v460_v9  ;;  %v705_v11 = vpop.f32.mrb[5].mxu0 }
 0x1ef   :  { %v463_v12 = vpop.f32.mrb[6].mxu0 }
 0x1f0   :  { %v637_v13 = vmul.f32 -1.442695, %v461_v10  ;;  %v706_v14 = vpop.f32.mrb[7].mxu0 }
 0x1f2   :  { %777 = vpow2.f32 %v637_v13 }
 0x1fc   :  { %v778_v15 = vpop.eup %777 }
 0x1fd   :  { %v469_v16 = vadd.f32 1.0, %v778_v15 }
 0x1ff   :  { %779 = vrcp.f32 %v469_v16 }
 0x209   :  { %v780_v17 = vpop.eup %779 }
 0x20a   :  { %v472_v18 = vpack.c.bf16 %v780_v17, %v780_v17 }
 0x20c   :  { %724 = vmatmul.mubr.bf16.vlgmr.msra.gmra.mrb[4].mxu1 %v472_v18 }
 0x2df   :  { %v578_v20 = vpop.f32.mrb[4].mxu1 }
 0x2e0   :  { %v579_v21 = vadd.f32 %v638_v19, %v578_v20  ;;  %v725_v22 = vpop.f32.mrb[5].mxu1 }
 0x2e1   :  { %v581_v23 = vpop.f32.mrb[6].mxu1 }
 0x2e2   :  { %584 = vst [vmem:[#allocation2] sm:$0x3] %v579_v21  ;;  %v726_v24 = vpop.f32.mrb[7].mxu1 }
 0x2e3   :  { %792 = shalt.err (!%p789_p4)
}
 0x2e4   :  { %s793_s6 = scalar_lea.hbm %s1032_s7, 32 }
 0x2e5   :  { %p794_p5 = scmp.ne.s32.totalorder %s1032_s7, %s793_s6  ;;  %p797_p6 = scmp.lt.u32.totalorder %s793_s6, %s1032_s7 }
 0x2e7   :  { %p799_p7 = pnand %p797_p6, %p794_p5 }
 0x2e9   :  { %802 = shalt.err (!%p799_p7)
}
 0x2ea   :  { %594 = dma.vmem_to_hbm [thread:$0]  %s592_s16, 32, %s1032_s7, [#allocation3]  }
 0x2eb   :  { %803 = dma.done.wait [#allocation3], 32  }
 0x2ec   :  { %804 = vsyncadd [#allocation3], 4294967264 }
 0x2ed   :  { %598 = vsyncpa [#allocation3], 1 }

</bundles_post_ra>
